<compile_context>
chip_gen: v7x
topology: tpu7x:2x2x1
jax: 0.10.0
libtpu: 0.0.40
codegen_flags: <defaults>
</compile_context>

<pallas_src>
import jax
import jax.numpy as jnp
from jax import lax
from jax.experimental import pallas as pl
from jax.experimental.pallas import tpu as pltpu


def _maxpool_kernel(x_ref, o_ref):
    # x_ref: (TR, k, Wc) block in VMEM with Wc = k * Wout; o_ref: (TR, Wout).
    k = x_ref.shape[1]
    wc = x_ref.shape[2]
    wout = o_ref.shape[1]

    # --- 1) pool over the k H-taps: contiguous slabs, pure VPU max ---------
    hmax = x_ref[:, 0, :]
    for di in range(1, k):
        hmax = jnp.maximum(hmax, x_ref[:, di, :])

    # --- 2) exact bf16 decomposition of the values --------------------------
    # f32 -> three bf16 components whose sum reconstructs the value exactly
    # (8+8+8 mantissa bits); bf16 input needs a single component.
    vals = hmax.astype(jnp.float32)
    n_splits = 1 if x_ref.dtype == jnp.bfloat16 else 3
    parts = []
    rem = vals
    for s in range(n_splits):
        p = rem.astype(jnp.bfloat16)
        parts.append(p)
        if s + 1 < n_splits:
            rem = rem - p.astype(jnp.float32)

    # --- 3) pool over the k W-taps via one-hot compaction on the MXU -------
    # sel_dj[w, j] = 1 iff w == j*k + dj, so (vals @ sel_dj)[t, j] picks
    # vals[t, j*k + dj] exactly (one product by 1.0, zeros elsewhere,
    # f32 accumulation).  Avoids lane-strided loads entirely.
    row = lax.broadcasted_iota(jnp.int32, (wc, wout), 0)
    col = lax.broadcasted_iota(jnp.int32, (wc, wout), 1)
    out = None
    for dj in range(k):
        sel = (row == col * k + dj).astype(jnp.float32).astype(jnp.bfloat16)
        tap = None
        for p in parts:
            c = jnp.dot(p, sel, preferred_element_type=jnp.float32)
            tap = c if tap is None else tap + c
        out = tap if out is None else jnp.maximum(out, tap)

    o_ref[...] = out.astype(o_ref.dtype)


def _round_up(n, m):
    return ((n + m - 1) // m) * m


def _pick_block_rows(num_rows, k, wc, itemsize, target_bytes):
    """Rows per grid step: ~target_bytes of padded VMEM per input buffer."""
    per_row = _round_up(k, 8) * _round_up(wc, 128) * itemsize   # padded slab
    rows = max(8, target_bytes // per_row)
    if rows >= num_rows:
        return num_rows                      # full extent is always legal
    return max(8, (rows // 8) * 8)           # output 2nd-minor must be 8-aligned


def maxpool2d(x, k=2, *, target_block_bytes=2 << 20):
    """Equivalent of torch.nn.MaxPool2d(kernel_size=k, stride=k) on NCHW."""
    N, C, H, W = x.shape
    hout, wout = H // k, W // k              # PyTorch floor mode, no padding
    wc = wout * k

    # Floor mode: only full windows contribute -> crop the ragged edge.
    if H != hout * k or W != wc:
        x = x[:, :, : hout * k, : wc]

    R = N * C * hout
    # Free reshape (no data movement): H splits contiguously into (Hout, k).
    xr = x.reshape(R, k, wc)

    itemsize = x.dtype.itemsize
    tr = _pick_block_rows(R, k, wc, itemsize, target_block_bytes)
    grid = (pl.cdiv(R, tr),)

    # VMEM budget from the (8,128)-padded, double-buffered block footprints.
    in_blk = tr * _round_up(k, 8) * _round_up(wc, 128) * itemsize
    out_blk = _round_up(tr, 8) * _round_up(wout, 128) * itemsize
    vmem_bytes = int(min(max(2 * (in_blk + out_blk) + (4 << 20), 16 << 20),
                         32 << 20))

    cost = pl.CostEstimate(
        flops=(k - 1) * R * wc + k * R * wout + 2 * 3 * k * R * wc * wout,
        transcendentals=0,
        bytes_accessed=(R * k * wc + R * wout) * itemsize,
    )

    out = pl.pallas_call(
        _maxpool_kernel,
        out_shape=jax.ShapeDtypeStruct((R, wout), x.dtype),
        grid=grid,
        in_specs=[pl.BlockSpec((tr, k, wc), lambda r: (r, 0, 0))],
        out_specs=pl.BlockSpec((tr, wout), lambda r: (r, 0)),
        compiler_params=pltpu.CompilerParams(
            dimension_semantics=("parallel",),
            vmem_limit_bytes=vmem_bytes,
        ),
        cost_estimate=cost,
    )(xr)

    return out.reshape(N, C, hout, wout)


def _maxpool2d_ref(x, k=2):
    # Pure-JAX reference with PyTorch MaxPool2d(k, k) semantics (floor mode).
    N, C, H, W = x.shape
    hout, wout = H // k, W // k
    xc = x[:, :, : hout * k, : wout * k]
    return xc.reshape(N, C, hout, k, wout, k).max(axis=(3, 5))


if __name__ == "__main__":
    key = jax.random.PRNGKey(0)
    x = jax.random.normal(key, (2, 4, 16, 16), dtype=jnp.float32)

    out = jax.block_until_ready(maxpool2d(x, k=2))
    ref = _maxpool2d_ref(x, k=2)
    assert out.shape == (2, 4, 8, 8), out.shape
    assert out.dtype == x.dtype, out.dtype
    assert jnp.array_equal(out, ref), "Pallas maxpool mismatch vs reference (f32)"

    # Floor-mode check on non-divisible spatial dims (matches nn.MaxPool2d(2, 2)).
    x2 = jax.random.normal(jax.random.PRNGKey(0), (1, 3, 15, 17), jnp.float32)
    out2 = jax.block_until_ready(maxpool2d(x2, k=2))
    assert out2.shape == (1, 3, 7, 8), out2.shape
    assert jnp.array_equal(out2, _maxpool2d_ref(x2, k=2)), "floor-mode mismatch"

    # bf16 end-to-end (halves HBM bytes; result stays bit-exact).
    xb = x.astype(jnp.bfloat16)
    outb = jax.block_until_ready(maxpool2d(xb, k=2))
    assert outb.dtype == jnp.bfloat16
    assert jnp.array_equal(outb, _maxpool2d_ref(xb, k=2)), "bf16 mismatch"

    print("KERNEL_OK")
</pallas_src>

<mosaic_0001>
module attributes {stable_mosaic.version = 11 : i64} {
  func.func @_maxpool_kernel(%arg0: i32, %arg1: memref<64x2x16xf32, #tpu.memory_space<vmem>>, %arg2: memref<64x8xf32, #tpu.memory_space<vmem>>) attributes {dimension_semantics = [#tpu.dimension_semantics<parallel>], iteration_bounds = array<i64: 1>, scalar_prefetch = 0 : i64, scratch_operands = 0 : i64, tpu.core_type = #tpu.core_type<tc>, window_params = [{transform_indices = @transform_0, window_bounds = array<i64: 64, 2, 16>}, {transform_indices = @transform_1, window_bounds = array<i64: 64, 8>}]} {
    %c0 = arith.constant 0 : index
    %c0_0 = arith.constant 0 : index
    %c0_1 = arith.constant 0 : index
    %0 = vector.load %arg1[%c0, %c0_0, %c0_1] : memref<64x2x16xf32, #tpu.memory_space<vmem>>, vector<64x1x16xf32>
    %1 = vector.shape_cast %0 : vector<64x1x16xf32> to vector<64x16xf32>
    %c0_2 = arith.constant 0 : index
    %c1 = arith.constant 1 : index
    %c0_3 = arith.constant 0 : index
    %2 = vector.load %arg1[%c0_2, %c1, %c0_3] : memref<64x2x16xf32, #tpu.memory_space<vmem>>, vector<64x1x16xf32>
    %3 = vector.shape_cast %2 : vector<64x1x16xf32> to vector<64x16xf32>
    %4 = arith.maximumf %1, %3 : vector<64x16xf32>
    %5 = arith.truncf %4 : vector<64x16xf32> to vector<64x16xbf16>
    %6 = arith.extf %5 : vector<64x16xbf16> to vector<64x16xf32>
    %7 = arith.subf %4, %6 : vector<64x16xf32>
    %8 = arith.truncf %7 : vector<64x16xf32> to vector<64x16xbf16>
    %9 = arith.extf %8 : vector<64x16xbf16> to vector<64x16xf32>
    %10 = arith.subf %7, %9 : vector<64x16xf32>
    %11 = arith.truncf %10 : vector<64x16xf32> to vector<64x16xbf16>
    %12 = tpu.iota {dimensions = array<i32: 0>} : vector<16x8xi32>
    %13 = tpu.iota {dimensions = array<i32: 1>} : vector<16x8xi32>
    %c2_i32 = arith.constant 2 : i32
    %14 = vector.broadcast %c2_i32 : i32 to vector<16x8xi32>
    %15 = arith.muli %13, %14 : vector<16x8xi32>
    %c0_i32 = arith.constant 0 : i32
    %16 = vector.broadcast %c0_i32 : i32 to vector<16x8xi32>
    %17 = arith.addi %15, %16 : vector<16x8xi32>
    %18 = arith.cmpi eq, %12, %17 : vector<16x8xi32>
    %19 = arith.extui %18 : vector<16x8xi1> to vector<16x8xi32>
    %20 = arith.sitofp %19 : vector<16x8xi32> to vector<16x8xf32>
    %21 = arith.truncf %20 : vector<16x8xf32> to vector<16x8xbf16>
    %cst = arith.constant dense<0.000000e+00> : vector<64x8xf32>
    %22 = tpu.matmul %5, %21, %cst {dimension_numbers = #tpu.dot_dimension_numbers<[1], [0], [0], [1], [0, 0, 1, 1], [], []>} : vector<64x16xbf16>, vector<16x8xbf16>, vector<64x8xf32> -> vector<64x8xf32>
    %cst_4 = arith.constant dense<0.000000e+00> : vector<64x8xf32>
    %23 = tpu.matmul %8, %21, %cst_4 {dimension_numbers = #tpu.dot_dimension_numbers<[1], [0], [0], [1], [0, 0, 1, 1], [], []>} : vector<64x16xbf16>, vector<16x8xbf16>, vector<64x8xf32> -> vector<64x8xf32>
    %24 = arith.addf %22, %23 : vector<64x8xf32>
    %cst_5 = arith.constant dense<0.000000e+00> : vector<64x8xf32>
    %25 = tpu.matmul %11, %21, %cst_5 {dimension_numbers = #tpu.dot_dimension_numbers<[1], [0], [0], [1], [0, 0, 1, 1], [], []>} : vector<64x16xbf16>, vector<16x8xbf16>, vector<64x8xf32> -> vector<64x8xf32>
    %26 = arith.addf %24, %25 : vector<64x8xf32>
    %c2_i32_6 = arith.constant 2 : i32
    %27 = vector.broadcast %c2_i32_6 : i32 to vector<16x8xi32>
    %28 = arith.muli %13, %27 : vector<16x8xi32>
    %c1_i32 = arith.constant 1 : i32
    %29 = vector.broadcast %c1_i32 : i32 to vector<16x8xi32>
    %30 = arith.addi %28, %29 : vector<16x8xi32>
    %31 = arith.cmpi eq, %12, %30 : vector<16x8xi32>
    %32 = arith.extui %31 : vector<16x8xi1> to vector<16x8xi32>
    %33 = arith.sitofp %32 : vector<16x8xi32> to vector<16x8xf32>
    %34 = arith.truncf %33 : vector<16x8xf32> to vector<16x8xbf16>
    %cst_7 = arith.constant dense<0.000000e+00> : vector<64x8xf32>
    %35 = tpu.matmul %5, %34, %cst_7 {dimension_numbers = #tpu.dot_dimension_numbers<[1], [0], [0], [1], [0, 0, 1, 1], [], []>} : vector<64x16xbf16>, vector<16x8xbf16>, vector<64x8xf32> -> vector<64x8xf32>
    %cst_8 = arith.constant dense<0.000000e+00> : vector<64x8xf32>
    %36 = tpu.matmul %8, %34, %cst_8 {dimension_numbers = #tpu.dot_dimension_numbers<[1], [0], [0], [1], [0, 0, 1, 1], [], []>} : vector<64x16xbf16>, vector<16x8xbf16>, vector<64x8xf32> -> vector<64x8xf32>
    %37 = arith.addf %35, %36 : vector<64x8xf32>
    %cst_9 = arith.constant dense<0.000000e+00> : vector<64x8xf32>
    %38 = tpu.matmul %11, %34, %cst_9 {dimension_numbers = #tpu.dot_dimension_numbers<[1], [0], [0], [1], [0, 0, 1, 1], [], []>} : vector<64x16xbf16>, vector<16x8xbf16>, vector<64x8xf32> -> vector<64x8xf32>
    %39 = arith.addf %37, %38 : vector<64x8xf32>
    %40 = arith.maximumf %26, %39 : vector<64x8xf32>
    %c0_10 = arith.constant 0 : index
    %c0_11 = arith.constant 0 : index
    %41 = vector.load %arg2[%c0_10, %c0_11] : memref<64x8xf32, #tpu.memory_space<vmem>>, vector<64x8xf32>
    tpu.vector_store %arg2[%c0_10, %c0_11], %40 {strides = array<i32>} : memref<64x8xf32, #tpu.memory_space<vmem>>, vector<64x8xf32>,
    return
  }
  func.func @transform_0(%arg0: i32) -> (i32, i32, i32) {
    %c0_i32 = arith.constant 0 : i32
    %c0_i32_0 = arith.constant 0 : i32
    %c0_i32_1 = arith.constant 0 : i32
    return %arg0, %c0_i32, %c0_i32_0 : i32, i32, i32
  }
  func.func @transform_1(%arg0: i32) -> (i32, i32) {
    %c0_i32 = arith.constant 0 : i32
    %c0_i32_0 = arith.constant 0 : i32
    return %arg0, %c0_i32 : i32, i32
  }
}

</mosaic_0001>

<bundles_post_ra>
// kernel: tpu_custom_call.1
= control target key start
LH: loop header
LB: loop body
LE: loop exit
PB: predicated region body
PF: predicated region fallthrough
CT: control target
= control target key end

     0   :  { %v649_v0 = vlaneseq  ;;  %v3619_v20 = vmov 1.0|1.0   ;;  %v3736_v28 = vmov 0  ;;  %vm791_vm6 = vcmask 1041409   ;;  %s3617_s0 = inlined_call_operand.vmem [shape: f32[64,2,16], index: 0, kind: input, shape index: {}]   ;;  %s3618_s1 = inlined_call_operand.vmem [shape: f32[64,8], index: 1, kind: output, shape index: {}]  }
   0x1   :  { %v9_v3 = vld [vmem:[%s3617_s0] sm:$0x1]  ;;  %v10_v6 = vld [vmem:[%s3617_s0 + $0x2] sm:$0x1]  ;;  %v11_v7 = vld [vmem:[%s3617_s0 + $0x4] sm:$0x1] }
   0x2   :  { %v650_v1 = vshrl.u32 %v649_v0, 7  ;;  %v653_v2 = vand.u32 127, %v649_v0  ;;  %v12_v8 = vld [vmem:[%s3617_s0 + $0x6] sm:$0x1]  ;;  %v13_v9 = vld [vmem:[%s3617_s0 + $0x8] sm:$0x1] }
   0x3   :  { %v14_v10 = vld [vmem:[%s3617_s0 + $0xa] sm:$0x1]  ;;  %v15_v12 = vld [vmem:[%s3617_s0 + $0xc] sm:$0x1]  ;;  %v16_v13 = vld [vmem:[%s3617_s0 + $0xe] sm:$0x1] }
   0x4   :  { %v651_v4 = vadd.s32 8, %v650_v1  ;;  %v654_v5 = vmul.u32 2, %v653_v2  ;;  %v17_v14 = vld [vmem:[%s3617_s0 + $0x10] sm:$0x1]  ;;  %v18_v16 = vld [vmem:[%s3617_s0 + $0x12] sm:$0x1] }
   0x5   :  { %v19_v17 = vld [vmem:[%s3617_s0 + $0x14] sm:$0x1]  ;;  %v20_v18 = vld [vmem:[%s3617_s0 + $0x16] sm:$0x1]  ;;  %v73_v19 = vld [vmem:[%s3617_s0 + $0x1] sm:$0x1] }
   0x6   :  { %vm655_vm0 = vcmp.eq.s32.totalorder %v650_v1, %v654_v5  ;;  %vm656_vm1 = vcmp.eq.s32.totalorder %v651_v4, %v654_v5  ;;  %v1641_v11 = vadd.s32 1, %v654_v5  ;;  %v21_v21 = vld [vmem:[%s3617_s0 + $0x18] sm:$0x1]  ;;  %v22_v22 = vld [vmem:[%s3617_s0 + $0x1a] sm:$0x1]  ;;  %v2111_v27 = vmax.f32 %v9_v3, %v73_v19 }
   0x7   :  { %vm2074_vm2 = vmpackc.low %vm656_vm1, %vm655_vm0  ;;  %v23_v23 = vld [vmem:[%s3617_s0 + $0x1c] sm:$0x1]  ;;  %v74_v24 = vld [vmem:[%s3617_s0 + $0x3] sm:$0x1]  ;;  %vm794_vm7 = vcmask 1042434   ;;  %vm797_vm8 = vcmask 1043459  }
   0x8   :  { %1943 = vmatprep.subr.msk.bf16.mxu0 %vm2074_vm2, %v3619_v20  ;;  %vm1642_vm3 = vcmp.eq.s32.totalorder %v650_v1, %v1641_v11  ;;  %vm1643_vm4 = vcmp.eq.s32.totalorder %v651_v4, %v1641_v11  ;;  %v75_v25 = vld [vmem:[%s3617_s0 + $0x5] sm:$0x1]  ;;  %v76_v26 = vld [vmem:[%s3617_s0 + $0x7] sm:$0x1]  ;;  %v24_v29 = vld [vmem:[%s3617_s0 + $0x1e] sm:$0x1]  ;;  %v138_v32 = vmax.f32 %v10_v6, %v74_v24  ;;  %v2143_v40 = vpack.c.bf16 %v2111_v27, %v2111_v27 }
   0x9   :  { %vm2113_vm5 = vmpackc.low %vm1643_vm4, %vm1642_vm3  ;;  %1944 = vmatpush3.bf16.msk.msra.mxu0 %vm2074_vm2, %v3619_v20  ;;  %v77_v30 = vld [vmem:[%s3617_s0 + $0x9] sm:$0x1]  ;;  %v78_v31 = vld [vmem:[%s3617_s0 + $0xb] sm:$0x1]  ;;  %v139_v33 = vmax.f32 %v11_v7, %v75_v25  ;;  %v140_v34 = vmax.f32 %v12_v8, %v76_v26  ;;  %vm800_vm9 = vcmask 1044484   ;;  %vm803_vm10 = vcmask 1045509  }
   0xa   :  { %v3737_v28 = vsel %vm2113_vm5, 4294967295, %v3736_v28  ;;  %1973 = vmatprep.subr.msk.bf16.mxu1 %vm2113_vm5, %v3619_v20  ;;  %v79_v35 = vld [vmem:[%s3617_s0 + $0xd] sm:$0x1]  ;;  %v80_v36 = vld [vmem:[%s3617_s0 + $0xf] sm:$0x1]  ;;  %v141_v38 = vmax.f32 %v13_v9, %v77_v30  ;;  %v142_v39 = vmax.f32 %v14_v10, %v78_v31  ;;  %3739 = vst [vmem:[#allocation3_spill] sm:$0xff] %v2143_v40  ;;  %1953 = vmatprep.subr.msk.bf16.mxu0 %vm2074_vm2, %v3619_v20  ;;  %v265_v9 = vunpack.c.l.bf16 %v2143_v40 }
   0xb   :  { %3738 = vst [vmem:[#allocation2_spill] sm:$0xff] %v3737_v28  ;;  %v81_v37 = vld [vmem:[%s3617_s0 + $0x11] sm:$0x1]  ;;  %1974 = vmatpush3.bf16.msk.msra.mxu1 %vm2113_vm5, %v3619_v20  ;;  %v82_v41 = vld [vmem:[%s3617_s0 + $0x13] sm:$0x1]  ;;  %v143_v44 = vmax.f32 %v15_v12, %v79_v35  ;;  %v144_v45 = vmax.f32 %v16_v13, %v80_v36  ;;  %v2160_v47 = vpack.c.bf16 %v138_v32, %v138_v32  ;;  %vm806_vm11 = vcmask 1046534  }
   0xc   :  { %v83_v42 = vld [vmem:[%s3617_s0 + $0x15] sm:$0x1]  ;;  %v84_v43 = vld [vmem:[%s3617_s0 + $0x17] sm:$0x1]  ;;  %v145_v46 = vmax.f32 %v17_v14, %v81_v37  ;;  %v85_v48 = vld [vmem:[%s3617_s0 + $0x19] sm:$0x1]  ;;  %v146_v51 = vmax.f32 %v18_v16, %v82_v41  ;;  %v2171_v54 = vpack.c.bf16 %v139_v33, %v139_v33  ;;  %1983 = vmatprep.subr.msk.bf16.mxu1 %vm2113_vm5, %v3619_v20  ;;  %v2179_v59 = vpack.c.bf16 %v140_v34, %v140_v34 }
   0xd   :  { %v86_v49 = vld [vmem:[%s3617_s0 + $0x1b] sm:$0x1]  ;;  %v87_v50 = vld [vmem:[%s3617_s0 + $0x1d] sm:$0x1]  ;;  %v147_v52 = vmax.f32 %v19_v17, %v83_v42  ;;  %v148_v53 = vmax.f32 %v20_v18, %v84_v43  ;;  %v88_v55 = vld [vmem:[%s3617_s0 + $0x1f] sm:$0x1]  ;;  %v149_v56 = vmax.f32 %v21_v21, %v85_v48  ;;  %v2181_v61 = vpack.c.bf16 %v141_v38, %v141_v38 }
   0xe   :  { %v150_v57 = vmax.f32 %v22_v22, %v86_v49  ;;  %v151_v58 = vmax.f32 %v23_v23, %v87_v50  ;;  %v152_v60 = vmax.f32 %v24_v29, %v88_v55  ;;  %v2183_v62 = vpack.c.bf16 %v142_v39, %v142_v39 }
   0xf   :  { %v2185_v63 = vpack.c.bf16 %v143_v44, %v143_v44  ;;  %v2187_v0 = vpack.c.bf16 %v144_v45, %v144_v45  ;;  %v2189_v1 = vpack.c.bf16 %v145_v46, %v145_v46  ;;  %v2191_v2 = vpack.c.bf16 %v146_v51, %v146_v51 }
  0x10   :  { %3740 = vst [vmem:[#allocation4_spill] sm:$0xff] %v2183_v62  ;;  %v2193_v3 = vpack.c.bf16 %v147_v52, %v147_v52  ;;  %v2195_v4 = vpack.c.bf16 %v148_v53, %v148_v53  ;;  %v2197_v5 = vpack.c.bf16 %v149_v56, %v149_v56  ;;  %v2199_v6 = vpack.c.bf16 %v150_v57, %v150_v57 }
  0x11   :  { %3741 = vst [vmem:[#allocation5_spill] sm:$0xff] %v2185_v63  ;;  %3742 = vst [vmem:[#allocation6_spill] sm:$0xff] %v2187_v0  ;;  %v2201_v7 = vpack.c.bf16 %v151_v58, %v151_v58  ;;  %v2203_v8 = vpack.c.bf16 %v152_v60, %v152_v60  ;;  %v266_v10 = vunpack.c.l.bf16 %v2160_v47  ;;  %v267_v11 = vunpack.c.l.bf16 %v2171_v54 }
  0x12   :  { %3743 = vst [vmem:[#allocation7_spill] sm:$0xff] %v2189_v1  ;;  %3744 = vst [vmem:[#allocation8_spill] sm:$0xff] %v2191_v2  ;;  %v268_v12 = vunpack.c.l.bf16 %v2179_v59  ;;  %v269_v13 = vunpack.c.l.bf16 %v2181_v61  ;;  %v270_v14 = vunpack.c.l.bf16 %v2183_v62  ;;  %v271_v16 = vunpack.c.l.bf16 %v2185_v63 }
  0x13   :  { %3745 = vst [vmem:[#allocation9_spill] sm:$0xff] %v2193_v3  ;;  %3746 = vst [vmem:[#allocation10_spill] sm:$0xff] %v2195_v4  ;;  %v272_v17 = vunpack.c.l.bf16 %v2187_v0  ;;  %v273_v18 = vunpack.c.l.bf16 %v2189_v1  ;;  %v274_v19 = vunpack.c.l.bf16 %v2191_v2  ;;  %v275_v21 = vunpack.c.l.bf16 %v2193_v3 }
  0x14   :  { %3747 = vst [vmem:[#allocation11_spill] sm:$0xff] %v2197_v5  ;;  %3748 = vst [vmem:[#allocation12_spill] sm:$0xff] %v2199_v6  ;;  %v276_v22 = vunpack.c.l.bf16 %v2195_v4  ;;  %v277_v23 = vunpack.c.l.bf16 %v2197_v5  ;;  %v278_v24 = vunpack.c.l.bf16 %v2199_v6  ;;  %v279_v25 = vunpack.c.l.bf16 %v2201_v7 }
  0x15   :  { %3749 = vst [vmem:[#allocation13_spill] sm:$0xff] %v2201_v7  ;;  %3750 = vst [vmem:[#allocation14_spill] sm:$0xff] %v2203_v8  ;;  %v280_v26 = vunpack.c.l.bf16 %v2203_v8  ;;  %v329_v29 = vsub.f32 %v2111_v27, %v265_v9  ;;  %v330_v30 = vsub.f32 %v138_v32, %v266_v10  ;;  %v331_v31 = vsub.f32 %v139_v33, %v267_v11 }
  0x16   :  { %v332_v35 = vsub.f32 %v140_v34, %v268_v12  ;;  %v333_v36 = vsub.f32 %v141_v38, %v269_v13  ;;  %v334_v37 = vsub.f32 %v142_v39, %v270_v14  ;;  %v335_v41 = vsub.f32 %v143_v44, %v271_v16 }
  0x17   :  { %v336_v42 = vsub.f32 %v144_v45, %v272_v17  ;;  %v337_v43 = vsub.f32 %v145_v46, %v273_v18  ;;  %v338_v48 = vsub.f32 %v146_v51, %v274_v19  ;;  %v339_v49 = vsub.f32 %v147_v52, %v275_v21 }
  0x18   :  { %v340_v50 = vsub.f32 %v148_v53, %v276_v22  ;;  %v341_v55 = vsub.f32 %v149_v56, %v277_v23  ;;  %v342_v20 = vsub.f32 %v150_v57, %v278_v24  ;;  %v343_v6 = vsub.f32 %v151_v58, %v279_v25 }
  0x19   :  { %v344_v5 = vsub.f32 %v152_v60, %v280_v26  ;;  %v2222_v7 = vpack.c.bf16 %v329_v29, %v329_v29  ;;  %v2224_v8 = vpack.c.bf16 %v330_v30, %v330_v30  ;;  %v2226_v27 = vpack.c.bf16 %v331_v31, %v331_v31 }
  0x1a   :  { %v2228_v32 = vpack.c.bf16 %v332_v35, %v332_v35  ;;  %v2230_v33 = vpack.c.bf16 %v333_v36, %v333_v36  ;;  %v2232_v34 = vpack.c.bf16 %v334_v37, %v334_v37  ;;  %v2234_v38 = vpack.c.bf16 %v335_v41, %v335_v41 }
  0x1b   :  { %v2236_v39 = vpack.c.bf16 %v336_v42, %v336_v42  ;;  %v2238_v44 = vpack.c.bf16 %v337_v43, %v337_v43  ;;  %v2240_v45 = vpack.c.bf16 %v338_v48, %v338_v48  ;;  %v2242_v46 = vpack.c.bf16 %v339_v49, %v339_v49 }
  0x1c   :  { %v2244_v51 = vpack.c.bf16 %v340_v50, %v340_v50  ;;  %v2246_v52 = vpack.c.bf16 %v341_v55, %v341_v55  ;;  %v2248_v53 = vpack.c.bf16 %v342_v20, %v342_v20  ;;  %v2250_v56 = vpack.c.bf16 %v343_v6, %v343_v6 }
  0x1d   :  { %v2252_v57 = vpack.c.bf16 %v344_v5, %v344_v5  ;;  %v457_v58 = vunpack.c.l.bf16 %v2222_v7  ;;  %v458_v60 = vunpack.c.l.bf16 %v2224_v8  ;;  %v459_v9 = vunpack.c.l.bf16 %v2226_v27 }
  0x1e   :  { %v460_v10 = vunpack.c.l.bf16 %v2228_v32  ;;  %v461_v11 = vunpack.c.l.bf16 %v2230_v33  ;;  %v462_v12 = vunpack.c.l.bf16 %v2232_v34  ;;  %v463_v13 = vunpack.c.l.bf16 %v2234_v38 }
  0x1f   :  { %v464_v14 = vunpack.c.l.bf16 %v2236_v39  ;;  %v465_v16 = vunpack.c.l.bf16 %v2238_v44  ;;  %v466_v17 = vunpack.c.l.bf16 %v2240_v45  ;;  %v467_v18 = vunpack.c.l.bf16 %v2242_v46 }
  0x20   :  { %v468_v19 = vunpack.c.l.bf16 %v2244_v51  ;;  %v469_v21 = vunpack.c.l.bf16 %v2246_v52  ;;  %v470_v22 = vunpack.c.l.bf16 %v2248_v53  ;;  %v471_v23 = vunpack.c.l.bf16 %v2250_v56 }
  0x21   :  { %v472_v24 = vunpack.c.l.bf16 %v2252_v57  ;;  %v2270_v25 = vsub.f32 %v329_v29, %v457_v58  ;;  %v2272_v26 = vsub.f32 %v330_v30, %v458_v60  ;;  %v2274_v4 = vsub.f32 %v331_v31, %v459_v9 }
  0x22   :  { %v2276_v3 = vsub.f32 %v332_v35, %v460_v10  ;;  %v2278_v2 = vsub.f32 %v333_v36, %v461_v11  ;;  %v2280_v1 = vsub.f32 %v334_v37, %v462_v12  ;;  %v2282_v0 = vsub.f32 %v335_v41, %v463_v13  ;;  %v28_v12 = vld [vmem:[%s3617_s0 + $0x26] sm:$0x1]  ;;  %v29_v13 = vld [vmem:[%s3617_s0 + $0x28] sm:$0x1] }
  0x23   :  { %3751 = vst [vmem:[#allocation15_spill] sm:$0xff] %v2270_v25  ;;  %3752 = vst [vmem:[#allocation16_spill] sm:$0xff] %v2272_v26  ;;  %v2284_v63 = vsub.f32 %v336_v42, %v464_v14  ;;  %v2286_v62 = vsub.f32 %v337_v43, %v465_v16  ;;  %v2288_v29 = vsub.f32 %v338_v48, %v466_v17  ;;  %v726_v42 = vunpack.c.l.b16 %v2222_v7  ;;  %v90_v14 = vld [vmem:[%s3617_s0 + $0x23] sm:$0x1] }
  0x24   :  { %3753 = vst [vmem:[#allocation17_spill] sm:$0xff] %v2274_v4  ;;  %3754 = vst [vmem:[#allocation18_spill] sm:$0xff] %v2276_v3  ;;  %v2290_v30 = vsub.f32 %v339_v49, %v467_v18  ;;  %v2292_v31 = vsub.f32 %v340_v50, %v468_v19  ;;  %v2294_v35 = vsub.f32 %v341_v55, %v469_v21  ;;  %v727_v43 = vunpack.c.l.b16 %v2224_v8  ;;  %v30_v21 = vld [vmem:[%s3617_s0 + $0x2a] sm:$0x1] }
  0x25   :  { %3755 = vst [vmem:[#allocation19_spill] sm:$0xff] %v2278_v2  ;;  %3756 = vst [vmem:[#allocation20_spill] sm:$0xff] %v2280_v1  ;;  %v2296_v36 = vsub.f32 %v342_v20, %v470_v22  ;;  %v2298_v37 = vsub.f32 %v343_v6, %v471_v23  ;;  %v2300_v41 = vsub.f32 %v344_v5, %v472_v24  ;;  %v728_v48 = vunpack.c.l.b16 %v2226_v27  ;;  %v31_v22 = vld [vmem:[%s3617_s0 + $0x2c] sm:$0x1]  ;;  %v91_v23 = vld [vmem:[%s3617_s0 + $0x25] sm:$0x1] }
  0x26   :  { %3757 = vst [vmem:[#allocation21_spill] sm:$0xff] %v2282_v0  ;;  %3758 = vst [vmem:[#allocation22_spill] sm:$0xff] %v2284_v63  ;;  %v729_v49 = vunpack.c.l.b16 %v2228_v32  ;;  %v730_v50 = vunpack.c.l.b16 %v2230_v33  ;;  %v731_v55 = vunpack.c.l.b16 %v2232_v34  ;;  %v732_v20 = vunpack.c.l.b16 %v2234_v38 }
  0x27   :  { %3759 = vst [vmem:[#allocation23_spill] sm:$0xff] %v2286_v62  ;;  %3760 = vst [vmem:[#allocation24_spill] sm:$0xff] %v2288_v29  ;;  %v733_v6 = vunpack.c.l.b16 %v2236_v39  ;;  %v734_v5 = vunpack.c.l.b16 %v2238_v44  ;;  %v735_v58 = vunpack.c.l.b16 %v2240_v45  ;;  %v736_v7 = vunpack.c.l.b16 %v2242_v46  ;;  %v25_v39 = vld [vmem:[%s3617_s0 + $0x20] sm:$0x1] }
  0x28   :  { %3761 = vst [vmem:[#allocation25_spill] sm:$0xff] %v2290_v30  ;;  %3762 = vst [vmem:[#allocation26_spill] sm:$0xff] %v2292_v31  ;;  %v737_v8 = vunpack.c.l.b16 %v2244_v51  ;;  %v738_v27 = vunpack.c.l.b16 %v2246_v52  ;;  %v739_v32 = vunpack.c.l.b16 %v2248_v53  ;;  %v740_v33 = vunpack.c.l.b16 %v2250_v56  ;;  %v26_v51 = vld [vmem:[%s3617_s0 + $0x22] sm:$0x1]  ;;  %v27_v52 = vld [vmem:[%s3617_s0 + $0x24] sm:$0x1] }
  0x29   :  { %3763 = vst [vmem:[#allocation27_spill] sm:$0xff] %v2294_v35  ;;  %3764 = vst [vmem:[#allocation28_spill] sm:$0xff] %v2296_v36  ;;  %v741_v34 = vunpack.c.l.b16 %v2252_v57  ;;  %v790_v60 = vrot.slane %v727_v43, 7  ;;  %v793_v38 = vrot.slane %v728_v48, 6  ;;  %v796_v9 = vrot.slane %v729_v49, 5 }
  0x2a   :  { %3765 = vst [vmem:[#allocation29_spill] sm:$0xff] %v2298_v37  ;;  %3766 = vst [vmem:[#allocation30_spill] sm:$0xff] %v2300_v41  ;;  %v799_v44 = vrot.slane %v730_v50, 4  ;;  %v802_v45 = vrot.slane %v731_v55, 3  ;;  %v805_v46 = vrot.slane %v732_v20, 2  ;;  %v808_v10 = vrot.slane %v733_v6, 1 }
  0x2b   :  { %v89_v53 = vld [vmem:[%s3617_s0 + $0x21] sm:$0x1]  ;;  %v792_v56 = vsel %vm791_vm6, %v790_v60, %v726_v42  ;;  %vm809_vm12 = vcmask 1047559   ;;  %v811_v57 = vrot.slane %v735_v58, 7  ;;  %v813_v11 = vrot.slane %v736_v7, 6 }
  0x2c   :  { %v795_v16 = vsel %vm794_vm7, %v793_v38, %v792_v56  ;;  %v815_v17 = vrot.slane %v737_v8, 5  ;;  %v817_v18 = vrot.slane %v738_v27, 4  ;;  %v819_v19 = vrot.slane %v739_v32, 3  ;;  %v32_v49 = vld [vmem:[%s3617_s0 + $0x2e] sm:$0x1] }
  0x2d   :  { %v798_v24 = vsel %vm797_vm8, %v796_v9, %v795_v16  ;;  %v812_v42 = vsel %vm791_vm6, %v811_v57, %v734_v5  ;;  %v821_v43 = vrot.slane %v740_v33, 2  ;;  %v823_v48 = vrot.slane %v741_v34, 1  ;;  %v33_v50 = vld [vmem:[%s3617_s0 + $0x30] sm:$0x1]  ;;  %v34_v55 = vld [vmem:[%s3617_s0 + $0x32] sm:$0x1] }
  0x2e   :  { %v92_v20 = vld [vmem:[%s3617_s0 + $0x27] sm:$0x1]  ;;  %v93_v6 = vld [vmem:[%s3617_s0 + $0x29] sm:$0x1]  ;;  %v801_v5 = vsel %vm800_vm9, %v799_v44, %v798_v24  ;;  %v814_v58 = vsel %vm794_vm7, %v813_v11, %v812_v42  ;;  %vm913_vm13 = vcmask 130048   ;;  %v2384_v34 = vmax.f32 %v25_v39, %v89_v53 }
  0x2f   :  { %v35_v7 = vld [vmem:[%s3617_s0 + $0x34] sm:$0x1]  ;;  %v36_v8 = vld [vmem:[%s3617_s0 + $0x36] sm:$0x1]  ;;  %v37_v27 = vld [vmem:[%s3617_s0 + $0x38] sm:$0x1]  ;;  %v804_v60 = vsel %vm803_vm10, %v802_v45, %v801_v5  ;;  %v816_v38 = vsel %vm797_vm8, %v815_v17, %v814_v58  ;;  %v2406_v57 = vmax.f32 %v26_v51, %v90_v14  ;;  %v2408_v11 = vmax.f32 %v27_v52, %v91_v23 }
  0x30   :  { %v94_v32 = vld [vmem:[%s3617_s0 + $0x2b] sm:$0x1]  ;;  %v95_v33 = vld [vmem:[%s3617_s0 + $0x2d] sm:$0x1]  ;;  %v38_v9 = vld [vmem:[%s3617_s0 + $0x3a] sm:$0x1]  ;;  %v807_v16 = vsel %vm806_vm11, %v805_v46, %v804_v60  ;;  %v818_v17 = vsel %vm800_vm9, %v817_v18, %v816_v38  ;;  %v156_v51 = vmax.f32 %v28_v12, %v92_v20  ;;  %v157_v14 = vmax.f32 %v29_v13, %v93_v6 }
  0x31   :  { %v39_v44 = vld [vmem:[%s3617_s0 + $0x3c] sm:$0x1]  ;;  %v40_v56 = vld [vmem:[%s3617_s0 + $0x3e] sm:$0x1]  ;;  %v96_v39 = vld [vmem:[%s3617_s0 + $0x2f] sm:$0x1]  ;;  %v810_v52 = vsel %vm809_vm12, %v808_v10, %v807_v16  ;;  %v820_v46 = vsel %vm803_vm10, %v819_v19, %v818_v17  ;;  %v158_v60 = vmax.f32 %v30_v21, %v94_v32  ;;  %v159_v38 = vmax.f32 %v31_v22, %v95_v33 }
  0x32   :  { %v97_v45 = vld [vmem:[%s3617_s0 + $0x31] sm:$0x1]  ;;  %v98_v53 = vld [vmem:[%s3617_s0 + $0x33] sm:$0x1]  ;;  %v99_v24 = vld [vmem:[%s3617_s0 + $0x35] sm:$0x1]  ;;  %v822_v12 = vsel %vm806_vm11, %v821_v43, %v820_v46  ;;  %v160_v13 = vmax.f32 %v32_v49, %v96_v39  ;;  %v2436_v31 = vpack.c.bf16 %v2384_v34, %v2384_v34  ;;  %v2440_v21 = vpack.c.bf16 %v2406_v57, %v2406_v57 }
  0x33   :  { %v100_v42 = vld [vmem:[%s3617_s0 + $0x37] sm:$0x1]  ;;  %v101_v5 = vld [vmem:[%s3617_s0 + $0x39] sm:$0x1]  ;;  %v102_v18 = vld [vmem:[%s3617_s0 + $0x3b] sm:$0x1]  ;;  %v161_v10 = vmax.f32 %v33_v50, %v97_v45  ;;  %v162_v20 = vmax.f32 %v34_v55, %v98_v53  ;;  %v824_v19 = vsel %vm809_vm12, %v823_v48, %v822_v12  ;;  %v163_v6 = vmax.f32 %v35_v7, %v99_v24 }
  0x34   :  { %v103_v23 = vld [vmem:[%s3617_s0 + $0x3d] sm:$0x1]  ;;  %v104_v58 = vld [vmem:[%s3617_s0 + $0x3f] sm:$0x1]  ;;  %v164_v16 = vmax.f32 %v36_v8, %v100_v42  ;;  %v165_v17 = vmax.f32 %v37_v27, %v101_v5  ;;  %v909_v41 = vpack.c.b16 %v824_v19, %v810_v52  ;;  %v166_v37 = vmax.f32 %v38_v9, %v102_v18  ;;  %3767 = vst [vmem:[#allocation31_spill] sm:$0xff] %v2436_v31 }
  0x35   :  { %v167_v36 = vmax.f32 %v39_v44, %v103_v23  ;;  %v168_v35 = vmax.f32 %v40_v56, %v104_v58  ;;  %3768 = vst [vmem:[#allocation32_spill] sm:$0xff] %v2440_v21  ;;  %v2444_v22 = vpack.c.bf16 %v2408_v11, %v2408_v11  ;;  %v2446_v43 = vpack.c.bf16 %v156_v51, %v156_v51 }
  0x36   :  { %1945 = vmatprep.mubr.msk.bf16.mxu0 %vm913_vm13, %v909_v41  ;;  %1975 = vmatprep.mubr.msk.bf16.mxu1 %vm913_vm13, %v909_v41  ;;  %v2450_v48 = vpack.c.bf16 %v157_v14, %v157_v14  ;;  %v2452_v49 = vpack.c.bf16 %v158_v60, %v158_v60  ;;  %v2454_v50 = vpack.c.bf16 %v159_v38, %v159_v38  ;;  %v281_v39 = vunpack.c.l.bf16 %v2436_v31 }
  0x37   :  { %3769 = vst [vmem:[#allocation33_spill] sm:$0xff] %v2444_v22  ;;  %3770 = vst [vmem:[#allocation34_spill] sm:$0xff] %v2446_v43  ;;  %v2457_v7 = vpack.c.bf16 %v160_v13, %v160_v13  ;;  %v2459_v8 = vpack.c.bf16 %v161_v10, %v161_v10  ;;  %v2461_v27 = vpack.c.bf16 %v162_v20, %v162_v20  ;;  %v282_v45 = vunpack.c.l.bf16 %v2440_v21 }
  0x38   :  { %3771 = vst [vmem:[#allocation35_spill] sm:$0xff] %v2450_v48  ;;  %3772 = vst [vmem:[#allocation36_spill] sm:$0xff] %v2452_v49  ;;  %v2463_v32 = vpack.c.bf16 %v163_v6, %v163_v6  ;;  %v2465_v33 = vpack.c.bf16 %v164_v16, %v164_v16  ;;  %v2467_v9 = vpack.c.bf16 %v165_v17, %v165_v17  ;;  %v283_v53 = vunpack.c.l.bf16 %v2444_v22 }
  0x39   :  { %3773 = vst [vmem:[#allocation37_spill] sm:$0xff] %v2454_v50  ;;  %3774 = vst [vmem:[#allocation38_spill] sm:$0xff] %v2457_v7  ;;  %v2469_v41 = vpack.c.bf16 %v166_v37, %v166_v37  ;;  %v2471_v44 = vpack.c.bf16 %v167_v36, %v167_v36  ;;  %v2473_v56 = vpack.c.bf16 %v168_v35, %v168_v35  ;;  %v284_v24 = vunpack.c.l.bf16 %v2446_v43 }
  0x3a   :  { %3775 = vst [vmem:[#allocation39_spill] sm:$0xff] %v2459_v8  ;;  %3776 = vst [vmem:[#allocation40_spill] sm:$0xff] %v2461_v27  ;;  %v285_v42 = vunpack.c.l.bf16 %v2450_v48  ;;  %v286_v5 = vunpack.c.l.bf16 %v2452_v49  ;;  %v287_v52 = vunpack.c.l.bf16 %v2454_v50  ;;  %v288_v46 = vunpack.c.l.bf16 %v2457_v7 }
  0x3b   :  { %3777 = vst [vmem:[#allocation41_spill] sm:$0xff] %v2463_v32  ;;  %3778 = vst [vmem:[#allocation42_spill] sm:$0xff] %v2465_v33  ;;  %v289_v18 = vunpack.c.l.bf16 %v2459_v8  ;;  %v290_v23 = vunpack.c.l.bf16 %v2461_v27  ;;  %v291_v58 = vunpack.c.l.bf16 %v2463_v32  ;;  %v292_v12 = vunpack.c.l.bf16 %v2465_v33 }
  0x3c   :  { %3779 = vst [vmem:[#allocation43_spill] sm:$0xff] %v2467_v9  ;;  %3780 = vst [vmem:[#allocation44_spill] sm:$0xff] %v2469_v41  ;;  %v293_v19 = vunpack.c.l.bf16 %v2467_v9  ;;  %v294_v55 = vunpack.c.l.bf16 %v2469_v41  ;;  %v295_v30 = vunpack.c.l.bf16 %v2471_v44  ;;  %v296_v29 = vunpack.c.l.bf16 %v2473_v56 }
  0x3d   :  { %3781 = vst [vmem:[#allocation45_spill] sm:$0xff] %v2471_v44  ;;  %3782 = vst [vmem:[#allocation46_spill] sm:$0xff] %v2473_v56  ;;  %v345_v62 = vsub.f32 %v2384_v34, %v281_v39  ;;  %v346_v63 = vsub.f32 %v2406_v57, %v282_v45  ;;  %v347_v0 = vsub.f32 %v2408_v11, %v283_v53  ;;  %vm1860_vm14 = vcmask 64512  }
  0x3e   :  { %v348_v1 = vsub.f32 %v156_v51, %v284_v24  ;;  %v349_v2 = vsub.f32 %v157_v14, %v285_v42  ;;  %v350_v3 = vsub.f32 %v158_v60, %v286_v5  ;;  %v351_v4 = vsub.f32 %v159_v38, %v287_v52 }
  0x3f   :  { %v352_v26 = vsub.f32 %v160_v13, %v288_v46  ;;  %v353_v25 = vsub.f32 %v161_v10, %v289_v18  ;;  %v354_v33 = vsub.f32 %v162_v20, %v290_v23  ;;  %v355_v9 = vsub.f32 %v163_v6, %v291_v58 }
  0x40   :  { %v356_v32 = vsub.f32 %v164_v16, %v292_v12  ;;  %v357_v41 = vsub.f32 %v165_v17, %v293_v19  ;;  %v358_v27 = vsub.f32 %v166_v37, %v294_v55  ;;  %v359_v44 = vsub.f32 %v167_v36, %v295_v30 }
  0x41   :  { %v360_v8 = vsub.f32 %v168_v35, %v296_v29  ;;  %v2494_v56 = vpack.c.bf16 %v345_v62, %v345_v62  ;;  %v2496_v34 = vpack.c.bf16 %v346_v63, %v346_v63  ;;  %v2498_v57 = vpack.c.bf16 %v347_v0, %v347_v0 }
  0x42   :  { %v2500_v11 = vpack.c.bf16 %v348_v1, %v348_v1  ;;  %v2502_v51 = vpack.c.bf16 %v349_v2, %v349_v2  ;;  %v2504_v14 = vpack.c.bf16 %v350_v3, %v350_v3  ;;  %v2506_v60 = vpack.c.bf16 %v351_v4, %v351_v4 }
  0x43   :  { %v2508_v38 = vpack.c.bf16 %v352_v26, %v352_v26  ;;  %v2510_v13 = vpack.c.bf16 %v353_v25, %v353_v25  ;;  %v2512_v30 = vpack.c.bf16 %v354_v33, %v354_v33  ;;  %v2514_v29 = vpack.c.bf16 %v355_v9, %v355_v9 }
  0x44   :  { %v2516_v35 = vpack.c.bf16 %v356_v32, %v356_v32  ;;  %v2518_v36 = vpack.c.bf16 %v357_v41, %v357_v41  ;;  %v2520_v37 = vpack.c.bf16 %v358_v27, %v358_v27  ;;  %v2522_v10 = vpack.c.bf16 %v359_v44, %v359_v44 }
  0x45   :  { %v2524_v20 = vpack.c.bf16 %v360_v8, %v360_v8  ;;  %v473_v6 = vunpack.c.l.bf16 %v2494_v56  ;;  %v474_v16 = vunpack.c.l.bf16 %v2496_v34  ;;  %v475_v17 = vunpack.c.l.bf16 %v2498_v57 }
  0x46   :  { %v476_v55 = vunpack.c.l.bf16 %v2500_v11  ;;  %v477_v39 = vunpack.c.l.bf16 %v2502_v51  ;;  %v478_v45 = vunpack.c.l.bf16 %v2504_v14  ;;  %v479_v53 = vunpack.c.l.bf16 %v2506_v60 }
  0x47   :  { %v480_v24 = vunpack.c.l.bf16 %v2508_v38  ;;  %v481_v42 = vunpack.c.l.bf16 %v2510_v13  ;;  %v482_v5 = vunpack.c.l.bf16 %v2512_v30  ;;  %v483_v52 = vunpack.c.l.bf16 %v2514_v29 }
  0x48   :  { %v484_v46 = vunpack.c.l.bf16 %v2516_v35  ;;  %v485_v18 = vunpack.c.l.bf16 %v2518_v36  ;;  %v486_v23 = vunpack.c.l.bf16 %v2520_v37  ;;  %v487_v58 = vunpack.c.l.bf16 %v2522_v10 }
  0x49   :  { %v488_v12 = vunpack.c.l.bf16 %v2524_v20  ;;  %v2542_v19 = vsub.f32 %v345_v62, %v473_v6  ;;  %v2544_v7 = vsub.f32 %v346_v63, %v474_v16  ;;  %v2546_v50 = vsub.f32 %v347_v0, %v475_v17 }
  0x4a   :  { %v2548_v49 = vsub.f32 %v348_v1, %v476_v55  ;;  %v2550_v48 = vsub.f32 %v349_v2, %v477_v39  ;;  %v2552_v43 = vsub.f32 %v350_v3, %v478_v45  ;;  %v2554_v22 = vsub.f32 %v351_v4, %v479_v53 }
  0x4b   :  { %v2556_v21 = vsub.f32 %v352_v26, %v480_v24  ;;  %v2558_v31 = vsub.f32 %v353_v25, %v481_v42  ;;  %v2560_v40 = vsub.f32 %v354_v33, %v482_v5  ;;  %v2562_v62 = vsub.f32 %v355_v9, %v483_v52 }
  0x4c   :  { %v2564_v63 = vsub.f32 %v356_v32, %v484_v46  ;;  %v2566_v0 = vsub.f32 %v357_v41, %v485_v18  ;;  %v2568_v1 = vsub.f32 %v358_v27, %v486_v23  ;;  %v2570_v2 = vsub.f32 %v359_v44, %v487_v58 }
  0x4d   :  { %v2572_v3 = vsub.f32 %v360_v8, %v488_v12  ;;  %v601_v4 = vpack.c.bf16 %v2542_v19, %v2542_v19  ;;  %v602_v25 = vpack.c.bf16 %v2544_v7, %v2544_v7  ;;  %v603_v26 = vpack.c.bf16 %v2546_v50, %v2546_v50 }
  0x4e   :  { %v604_v32 = vpack.c.bf16 %v2548_v49, %v2548_v49  ;;  %v605_v27 = vpack.c.bf16 %v2550_v48, %v2550_v48  ;;  %v606_v33 = vpack.c.bf16 %v2552_v43, %v2552_v43  ;;  %v607_v8 = vpack.c.bf16 %v2554_v22, %v2554_v22 }
  0x4f   :  { %v608_v9 = vpack.c.bf16 %v2556_v21, %v2556_v21  ;;  %v609_v7 = vpack.c.bf16 %v2558_v31, %v2558_v31  ;;  %v610_v50 = vpack.c.bf16 %v2560_v40, %v2560_v40  ;;  %v611_v49 = vpack.c.bf16 %v2562_v62, %v2562_v62 }
  0x50   :  { %v612_v48 = vpack.c.bf16 %v2564_v63, %v2564_v63  ;;  %v613_v43 = vpack.c.bf16 %v2566_v0, %v2566_v0  ;;  %v614_v22 = vpack.c.bf16 %v2568_v1, %v2568_v1  ;;  %v615_v21 = vpack.c.bf16 %v2570_v2, %v2570_v2 }
  0x51   :  { %v616_v31 = vpack.c.bf16 %v2572_v3, %v2572_v3  ;;  %v742_v40 = vunpack.c.l.b16 %v2494_v56  ;;  %v743_v41 = vunpack.c.l.b16 %v2496_v34  ;;  %v744_v44 = vunpack.c.l.b16 %v2498_v57  ;;  %v48_v3 = vld [vmem:[%s3617_s0 + $0x4e] sm:$0x1] }
  0x52   :  { %v745_v6 = vunpack.c.l.b16 %v2500_v11  ;;  %v746_v16 = vunpack.c.l.b16 %v2502_v51  ;;  %v747_v17 = vunpack.c.l.b16 %v2504_v14  ;;  %v748_v55 = vunpack.c.l.b16 %v2506_v60 }
  0x53   :  { %v749_v39 = vunpack.c.l.b16 %v2508_v38  ;;  %v750_v45 = vunpack.c.l.b16 %v2510_v13  ;;  %v751_v53 = vunpack.c.l.b16 %v2512_v30  ;;  %v752_v56 = vunpack.c.l.b16 %v2514_v29 }
  0x54   :  { %v753_v34 = vunpack.c.l.b16 %v2516_v35  ;;  %v754_v57 = vunpack.c.l.b16 %v2518_v36  ;;  %v755_v11 = vunpack.c.l.b16 %v2520_v37  ;;  %v756_v51 = vunpack.c.l.b16 %v2522_v10 }
  0x55   :  { %v757_v14 = vunpack.c.l.b16 %v2524_v20  ;;  %v825_v24 = vrot.slane %v743_v41, 7  ;;  %v827_v60 = vrot.slane %v744_v44, 6  ;;  %v829_v42 = vrot.slane %v745_v6, 5 }
  0x56   :  { %v831_v38 = vrot.slane %v746_v16, 4  ;;  %v833_v5 = vrot.slane %v747_v17, 3  ;;  %v835_v13 = vrot.slane %v748_v55, 2  ;;  %v837_v52 = vrot.slane %v749_v39, 1 }
  0x57   :  { %v826_v30 = vsel %vm791_vm6, %v825_v24, %v742_v40  ;;  %v839_v29 = vrot.slane %v751_v53, 7  ;;  %v841_v46 = vrot.slane %v752_v56, 6  ;;  %v843_v35 = vrot.slane %v753_v34, 5  ;;  %v46_v24 = vld [vmem:[%s3617_s0 + $0x4a] sm:$0x1] }
  0x58   :  { %v828_v36 = vsel %vm794_vm7, %v827_v60, %v826_v30  ;;  %v845_v18 = vrot.slane %v754_v57, 4  ;;  %v847_v37 = vrot.slane %v755_v11, 3  ;;  %v849_v23 = vrot.slane %v756_v51, 2  ;;  %v47_v60 = vld [vmem:[%s3617_s0 + $0x4c] sm:$0x1] }
  0x59   :  { %v830_v10 = vsel %vm797_vm8, %v829_v42, %v828_v36  ;;  %v840_v20 = vsel %vm791_vm6, %v839_v29, %v750_v45  ;;  %v851_v58 = vrot.slane %v757_v14, 1  ;;  %v2626_v12 = vunpack.c.l.b16 %v601_v4  ;;  %v45_v14 = vld [vmem:[%s3617_s0 + $0x48] sm:$0x1]  ;;  %v110_v42 = vld [vmem:[%s3617_s0 + $0x4b] sm:$0x1] }
  0x5a   :  { %v832_v19 = vsel %vm800_vm9, %v831_v38, %v830_v10  ;;  %v842_v62 = vsel %vm794_vm7, %v841_v46, %v840_v20  ;;  %v2630_v63 = vunpack.c.l.b16 %v602_v25  ;;  %v2632_v0 = vunpack.c.l.b16 %v603_v26  ;;  %v111_v38 = vld [vmem:[%s3617_s0 + $0x4d] sm:$0x1]  ;;  %v49_v46 = vld [vmem:[%s3617_s0 + $0x50] sm:$0x1]  ;;  %v51_v36 = vld [vmem:[%s3617_s0 + $0x54] sm:$0x1] }
  0x5b   :  { %3783 = vst [vmem:[#allocation47_spill] sm:$0xff] %v2626_v12  ;;  %v834_v1 = vsel %vm803_vm10, %v833_v5, %v832_v19  ;;  %v844_v2 = vsel %vm797_vm8, %v843_v35, %v842_v62  ;;  %v2636_v40 = vunpack.c.l.b16 %v604_v32  ;;  %v2638_v41 = vunpack.c.l.b16 %v605_v27  ;;  %v112_v5 = vld [vmem:[%s3617_s0 + $0x4f] sm:$0x1]  ;;  %v50_v35 = vld [vmem:[%s3617_s0 + $0x52] sm:$0x1] }
  0x5c   :  { %3784 = vst [vmem:[#allocation48_spill] sm:$0xff] %v2630_v63  ;;  %3785 = vst [vmem:[#allocation49_spill] sm:$0xff] %v2632_v0  ;;  %v836_v44 = vsel %vm806_vm11, %v835_v13, %v834_v1  ;;  %v846_v4 = vsel %vm800_vm9, %v845_v18, %v844_v2  ;;  %v2642_v6 = vunpack.c.l.b16 %v606_v33  ;;  %v2644_v16 = vunpack.c.l.b16 %v607_v8  ;;  %v52_v18 = vld [vmem:[%s3617_s0 + $0x56] sm:$0x1]  ;;  %v115_v10 = vld [vmem:[%s3617_s0 + $0x55] sm:$0x1] }
  0x5d   :  { %3786 = vst [vmem:[#allocation50_spill] sm:$0xff] %v2636_v40  ;;  %3787 = vst [vmem:[#allocation51_spill] sm:$0xff] %v2638_v41  ;;  %v838_v25 = vsel %vm809_vm12, %v837_v52, %v836_v44  ;;  %v848_v26 = vsel %vm803_vm10, %v847_v37, %v846_v4  ;;  %v2648_v17 = vunpack.c.l.b16 %v608_v9  ;;  %v2650_v55 = vunpack.c.l.b16 %v609_v7  ;;  %v41_v9 = vld [vmem:[%s3617_s0 + $0x40] sm:$0x1]  ;;  %v42_v7 = vld [vmem:[%s3617_s0 + $0x42] sm:$0x1] }
  0x5e   :  { %3788 = vst [vmem:[#allocation52_spill] sm:$0xff] %v2642_v6  ;;  %3789 = vst [vmem:[#allocation53_spill] sm:$0xff] %v2644_v16  ;;  %v850_v32 = vsel %vm806_vm11, %v849_v23, %v848_v26  ;;  %v2653_v27 = vunpack.c.l.b16 %v610_v50  ;;  %v2655_v39 = vunpack.c.l.b16 %v611_v49  ;;  %v2657_v45 = vunpack.c.l.b16 %v612_v48  ;;  %v43_v50 = vld [vmem:[%s3617_s0 + $0x44] sm:$0x1]  ;;  %v44_v49 = vld [vmem:[%s3617_s0 + $0x46] sm:$0x1] }
  0x5f   :  { %3790 = vst [vmem:[#allocation54_spill] sm:$0xff] %v2648_v17  ;;  %3791 = vst [vmem:[#allocation55_spill] sm:$0xff] %v2650_v55  ;;  %v852_v33 = vsel %vm809_vm12, %v851_v58, %v850_v32  ;;  %v2660_v8 = vunpack.c.l.b16 %v613_v43  ;;  %v2662_v53 = vunpack.c.l.b16 %v614_v22  ;;  %v2664_v56 = vunpack.c.l.b16 %v615_v21  ;;  %v105_v48 = vld [vmem:[%s3617_s0 + $0x41] sm:$0x1]  ;;  %v106_v43 = vld [vmem:[%s3617_s0 + $0x43] sm:$0x1] }
  0x60   :  { %3792 = vst [vmem:[#allocation56_spill] sm:$0xff] %v2653_v27  ;;  %3793 = vst [vmem:[#allocation57_spill] sm:$0xff] %v2655_v39  ;;  %v107_v22 = vld [vmem:[%s3617_s0 + $0x45] sm:$0x1]  ;;  %v108_v21 = vld [vmem:[%s3617_s0 + $0x47] sm:$0x1]  ;;  %v910_v34 = vpack.c.b16 %v852_v33, %v838_v25  ;;  %v2693_v57 = vunpack.c.l.b16 %v616_v31  ;;  %v169_v26 = vmax.f32 %v41_v9, %v105_v48  ;;  %v170_v30 = vmax.f32 %v42_v7, %v106_v43 }
  0x61   :  { %3794 = vst [vmem:[#allocation58_spill] sm:$0xff] %v2657_v45  ;;  %3795 = vst [vmem:[#allocation59_spill] sm:$0xff] %v2660_v8  ;;  %v109_v31 = vld [vmem:[%s3617_s0 + $0x49] sm:$0x1]  ;;  %v113_v37 = vld [vmem:[%s3617_s0 + $0x51] sm:$0x1]  ;;  %v171_v62 = vmax.f32 %v43_v50, %v107_v22  ;;  %v172_v52 = vmax.f32 %v44_v49, %v108_v21  ;;  %v174_v13 = vmax.f32 %v46_v24, %v110_v42 }
  0x62   :  { %3796 = vst [vmem:[#allocation60_spill] sm:$0xff] %v2662_v53  ;;  %3797 = vst [vmem:[#allocation61_spill] sm:$0xff] %v2664_v56  ;;  %v114_v23 = vld [vmem:[%s3617_s0 + $0x53] sm:$0x1]  ;;  %1946 = vmatmul.mubr.msk.bf16.vlgmr.msra.gmra.mrb[0].mxu0 %vm913_vm13, %v910_v34  ;;  %1976 = vmatmul.mubr.msk.bf16.vlgmr.msra.gmra.mrb[0].mxu1 %vm913_vm13, %v910_v34  ;;  %v53_v1 = vld [vmem:[%s3617_s0 + $0x58] sm:$0x1]  ;;  %v173_v19 = vmax.f32 %v45_v14, %v109_v31  ;;  %v175_v58 = vmax.f32 %v47_v60, %v111_v38 }
  0x63   :  { %3798 = vst [vmem:[#allocation62_spill] sm:$0xff] %v2693_v57  ;;  %v54_v2 = vld [vmem:[%s3617_s0 + $0x5a] sm:$0x1]  ;;  %v55_v44 = vld [vmem:[%s3617_s0 + $0x5c] sm:$0x1]  ;;  %v176_v51 = vmax.f32 %v48_v3, %v112_v5  ;;  %v177_v11 = vmax.f32 %v49_v46, %v113_v37  ;;  %v178_v57 = vmax.f32 %v50_v35, %v114_v23  ;;  %v179_v56 = vmax.f32 %v51_v36, %v115_v10 }
  0x64   :  { %v56_v4 = vld [vmem:[%s3617_s0 + $0x5e] sm:$0x1]  ;;  %v116_v25 = vld [vmem:[%s3617_s0 + $0x57] sm:$0x1]  ;;  %v3799_v20 = vmov 1.0|1.0   ;;  %v2795_v48 = vpack.c.bf16 %v169_v26, %v169_v26  ;;  %v2797_v43 = vpack.c.bf16 %v170_v30, %v170_v30  ;;  %v2799_v22 = vpack.c.bf16 %v171_v62, %v171_v62 }
  0x65   :  { %1954 = vmatpush3.bf16.msk.msra.mxu0 %vm2074_vm2, %v3799_v20  ;;  %1984 = vmatpush3.bf16.msk.msra.mxu1 %vm2113_vm5, %v3799_v20  ;;  %v117_v29 = vld [vmem:[%s3617_s0 + $0x59] sm:$0x1]  ;;  %v118_v32 = vld [vmem:[%s3617_s0 + $0x5b] sm:$0x1]  ;;  %v119_v34 = vld [vmem:[%s3617_s0 + $0x5d] sm:$0x1]  ;;  %v180_v17 = vmax.f32 %v52_v18, %v116_v25  ;;  %v2801_v21 = vpack.c.bf16 %v172_v52, %v172_v52  ;;  %v2803_v14 = vpack.c.bf16 %v173_v19, %v173_v19 }
  0x66   :  { %v120_v33 = vld [vmem:[%s3617_s0 + $0x5f] sm:$0x1]  ;;  %1963 = vmatprep.subr.msk.bf16.mxu0 %vm2074_vm2, %v3799_v20  ;;  %1993 = vmatprep.subr.msk.bf16.mxu1 %vm2113_vm5, %v3799_v20  ;;  %v181_v9 = vmax.f32 %v53_v1, %v117_v29  ;;  %v182_v7 = vmax.f32 %v54_v2, %v118_v32  ;;  %v183_v50 = vmax.f32 %v55_v44, %v119_v34  ;;  %v297_v18 = vunpack.c.l.bf16 %v2795_v48 }
  0x67   :  { %v184_v49 = vmax.f32 %v56_v4, %v120_v33  ;;  %v2805_v24 = vpack.c.bf16 %v174_v13, %v174_v13  ;;  %v2807_v60 = vpack.c.bf16 %v175_v58, %v175_v58  ;;  %v2809_v3 = vpack.c.bf16 %v176_v51, %v176_v51 }
  0x68   :  { %v2811_v31 = vpack.c.bf16 %v177_v11, %v177_v11  ;;  %v2813_v42 = vpack.c.bf16 %v178_v57, %v178_v57  ;;  %v2815_v38 = vpack.c.bf16 %v179_v56, %v179_v56  ;;  %v2817_v5 = vpack.c.bf16 %v180_v17, %v180_v17 }
  0x69   :  { %v2819_v29 = vpack.c.bf16 %v181_v9, %v181_v9  ;;  %v2821_v46 = vpack.c.bf16 %v182_v7, %v182_v7  ;;  %v2823_v35 = vpack.c.bf16 %v183_v50, %v183_v50  ;;  %v2825_v36 = vpack.c.bf16 %v184_v49, %v184_v49 }
  0x6a   :  { %v298_v37 = vunpack.c.l.bf16 %v2797_v43  ;;  %v299_v23 = vunpack.c.l.bf16 %v2799_v22  ;;  %v300_v10 = vunpack.c.l.bf16 %v2801_v21  ;;  %v301_v1 = vunpack.c.l.bf16 %v2803_v14 }
  0x6b   :  { %v302_v2 = vunpack.c.l.bf16 %v2805_v24  ;;  %v303_v44 = vunpack.c.l.bf16 %v2807_v60  ;;  %v304_v4 = vunpack.c.l.bf16 %v2809_v3  ;;  %v305_v25 = vunpack.c.l.bf16 %v2811_v31 }
  0x6c   :  { %v306_v32 = vunpack.c.l.bf16 %v2813_v42  ;;  %v307_v33 = vunpack.c.l.bf16 %v2815_v38  ;;  %v308_v34 = vunpack.c.l.bf16 %v2817_v5  ;;  %v309_v53 = vunpack.c.l.bf16 %v2819_v29 }
  0x6d   :  { %v310_v16 = vunpack.c.l.bf16 %v2821_v46  ;;  %v311_v8 = vunpack.c.l.bf16 %v2823_v35  ;;  %v312_v6 = vunpack.c.l.bf16 %v2825_v36  ;;  %v2843_v45 = vsub.f32 %v169_v26, %v297_v18 }
  0x6e   :  { %v2845_v41 = vsub.f32 %v170_v30, %v298_v37  ;;  %v2847_v39 = vsub.f32 %v171_v62, %v299_v23  ;;  %v2849_v40 = vsub.f32 %v172_v52, %v300_v10  ;;  %v2851_v27 = vsub.f32 %v173_v19, %v301_v1 }
  0x6f   :  { %3800 = vst [vmem:[#allocation63_spill] sm:$0xff] %v2843_v45  ;;  %v2853_v55 = vsub.f32 %v174_v13, %v302_v2  ;;  %v2855_v0 = vsub.f32 %v175_v58, %v303_v44  ;;  %v2857_v63 = vsub.f32 %v176_v51, %v304_v4  ;;  %v2859_v12 = vsub.f32 %v177_v11, %v305_v25 }
  0x70   :  { %3801 = vst [vmem:[#allocation64_spill] sm:$0xff] %v2845_v41  ;;  %3802 = vst [vmem:[#allocation65_spill] sm:$0xff] %v2847_v39  ;;  %v2861_v28 = vsub.f32 %v178_v57, %v306_v32  ;;  %v2863_v26 = vsub.f32 %v179_v56, %v307_v33  ;;  %v2865_v30 = vsub.f32 %v180_v17, %v308_v34 }
  0x71   :  { %3803 = vst [vmem:[#allocation66_spill] sm:$0xff] %v2849_v40  ;;  %3804 = vst [vmem:[#allocation67_spill] sm:$0xff] %v2851_v27  ;;  %v2867_v62 = vsub.f32 %v181_v9, %v309_v53  ;;  %v2869_v52 = vsub.f32 %v182_v7, %v310_v16  ;;  %v2871_v19 = vsub.f32 %v183_v50, %v311_v8 }
  0x72   :  { %3805 = vst [vmem:[#allocation68_spill] sm:$0xff] %v2853_v55  ;;  %3806 = vst [vmem:[#allocation69_spill] sm:$0xff] %v2855_v0  ;;  %v2873_v13 = vsub.f32 %v184_v49, %v312_v6  ;;  %v2877_v51 = vpack.c.bf16 %v2843_v45, %v2843_v45  ;;  %v2881_v57 = vpack.c.bf16 %v2845_v41, %v2845_v41 }
  0x73   :  { %3807 = vst [vmem:[#allocation70_spill] sm:$0xff] %v2857_v63  ;;  %3808 = vst [vmem:[#allocation71_spill] sm:$0xff] %v2859_v12  ;;  %v2885_v17 = vpack.c.bf16 %v2847_v39, %v2847_v39  ;;  %v2889_v16 = vpack.c.bf16 %v2849_v40, %v2849_v40  ;;  %v2893_v6 = vpack.c.bf16 %v2851_v27, %v2851_v27  ;;  %v58_v27 = vld [vmem:[%s3617_s0 + $0x62] sm:$0x1]  ;;  %v59_v40 = vld [vmem:[%s3617_s0 + $0x64] sm:$0x1] }
  0x74   :  { %3809 = vst [vmem:[#allocation72_spill] sm:$0xff] %v2861_v28  ;;  %3810 = vst [vmem:[#allocation73_spill] sm:$0xff] %v2863_v26  ;;  %v2897_v8 = vpack.c.bf16 %v2853_v55, %v2853_v55  ;;  %v2901_v53 = vpack.c.bf16 %v2855_v0, %v2855_v0  ;;  %v2905_v56 = vpack.c.bf16 %v2857_v63, %v2857_v63  ;;  %v758_v23 = vunpack.c.l.b16 %v2877_v51  ;;  %v121_v39 = vld [vmem:[%s3617_s0 + $0x61] sm:$0x1] }
  0x75   :  { %3811 = vst [vmem:[#allocation74_spill] sm:$0xff] %v2865_v30  ;;  %3812 = vst [vmem:[#allocation75_spill] sm:$0xff] %v2867_v62  ;;  %v2909_v11 = vpack.c.bf16 %v2859_v12, %v2859_v12  ;;  %v2913_v58 = vpack.c.bf16 %v2861_v28, %v2861_v28  ;;  %v2917_v9 = vpack.c.bf16 %v2863_v26, %v2863_v26  ;;  %v759_v10 = vunpack.c.l.b16 %v2881_v57  ;;  %v57_v28 = vld [vmem:[%s3617_s0 + $0x60] sm:$0x1] }
  0x76   :  { %3813 = vst [vmem:[#allocation76_spill] sm:$0xff] %v2869_v52  ;;  %3814 = vst [vmem:[#allocation77_spill] sm:$0xff] %v2871_v19  ;;  %v2921_v7 = vpack.c.bf16 %v2865_v30, %v2865_v30  ;;  %v2925_v50 = vpack.c.bf16 %v2867_v62, %v2867_v62  ;;  %v2929_v49 = vpack.c.bf16 %v2869_v52, %v2869_v52  ;;  %v760_v1 = vunpack.c.l.b16 %v2885_v17 }
  0x77   :  { %3815 = vst [vmem:[#allocation78_spill] sm:$0xff] %v2873_v13  ;;  %3816 = vst [vmem:[#allocation79_spill] sm:$0xff] %v2877_v51  ;;  %v2933_v18 = vpack.c.bf16 %v2871_v19, %v2871_v19  ;;  %v2937_v37 = vpack.c.bf16 %v2873_v13, %v2873_v13  ;;  %v761_v2 = vunpack.c.l.b16 %v2889_v16  ;;  %v762_v44 = vunpack.c.l.b16 %v2893_v6 }
  0x78   :  { %3817 = vst [vmem:[#allocation80_spill] sm:$0xff] %v2881_v57  ;;  %3818 = vst [vmem:[#allocation81_spill] sm:$0xff] %v2885_v17  ;;  %v763_v4 = vunpack.c.l.b16 %v2897_v8  ;;  %v764_v25 = vunpack.c.l.b16 %v2901_v53  ;;  %v765_v32 = vunpack.c.l.b16 %v2905_v56  ;;  %v766_v33 = vunpack.c.l.b16 %v2909_v11 }
  0x79   :  { %3819 = vst [vmem:[#allocation82_spill] sm:$0xff] %v2889_v16  ;;  %3820 = vst [vmem:[#allocation83_spill] sm:$0xff] %v2893_v6  ;;  %v767_v34 = vunpack.c.l.b16 %v2913_v58  ;;  %v768_v13 = vunpack.c.l.b16 %v2917_v9  ;;  %v769_v19 = vunpack.c.l.b16 %v2921_v7  ;;  %v770_v52 = vunpack.c.l.b16 %v2925_v50  ;;  %v131_v6 = vld [vmem:[%s3617_s0 + $0x75] sm:$0x1]  ;;  %v132_v16 = vld [vmem:[%s3617_s0 + $0x77] sm:$0x1] }
  0x7a   :  { %3821 = vst [vmem:[#allocation84_spill] sm:$0xff] %v2897_v8  ;;  %3822 = vst [vmem:[#allocation85_spill] sm:$0xff] %v2901_v53  ;;  %v771_v62 = vunpack.c.l.b16 %v2929_v49  ;;  %v772_v30 = vunpack.c.l.b16 %v2933_v18  ;;  %v773_v26 = vunpack.c.l.b16 %v2937_v37  ;;  %v853_v12 = vrot.slane %v759_v10, 7  ;;  %v60_v10 = vld [vmem:[%s3617_s0 + $0x66] sm:$0x1] }
  0x7b   :  { %3823 = vst [vmem:[#allocation86_spill] sm:$0xff] %v2905_v56  ;;  %3824 = vst [vmem:[#allocation87_spill] sm:$0xff] %v2909_v11  ;;  %v855_v63 = vrot.slane %v760_v1, 6  ;;  %v857_v0 = vrot.slane %v761_v2, 5  ;;  %v859_v55 = vrot.slane %v762_v44, 4  ;;  %v861_v41 = vrot.slane %v763_v4, 3 }
  0x7c   :  { %3825 = vst [vmem:[#allocation88_spill] sm:$0xff] %v2913_v58  ;;  %3826 = vst [vmem:[#allocation89_spill] sm:$0xff] %v2917_v9  ;;  %v863_v45 = vrot.slane %v764_v25, 2  ;;  %v61_v1 = vld [vmem:[%s3617_s0 + $0x68] sm:$0x1]  ;;  %v854_v44 = vsel %vm791_vm6, %v853_v12, %v758_v23  ;;  %v873_v4 = vrot.slane %v770_v52, 4 }
  0x7d   :  { %3827 = vst [vmem:[#allocation90_spill] sm:$0xff] %v2921_v7  ;;  %3828 = vst [vmem:[#allocation91_spill] sm:$0xff] %v2925_v50  ;;  %v122_v2 = vld [vmem:[%s3617_s0 + $0x63] sm:$0x1]  ;;  %v871_v50 = vrot.slane %v769_v19, 5  ;;  %v856_v7 = vsel %vm794_vm7, %v855_v63, %v854_v44  ;;  %v875_v12 = vrot.slane %v771_v62, 3 }
  0x7e   :  { %3829 = vst [vmem:[#allocation92_spill] sm:$0xff] %v2929_v49  ;;  %3830 = vst [vmem:[#allocation93_spill] sm:$0xff] %v2933_v18  ;;  %v867_v18 = vrot.slane %v767_v34, 7  ;;  %v869_v49 = vrot.slane %v768_v13, 6  ;;  %v62_v25 = vld [vmem:[%s3617_s0 + $0x6a] sm:$0x1] }
  0x7f   :  { %3831 = vst [vmem:[#allocation94_spill] sm:$0xff] %v2937_v37  ;;  %v865_v37 = vrot.slane %v765_v32, 1  ;;  %v63_v32 = vld [vmem:[%s3617_s0 + $0x6c] sm:$0x1]  ;;  %v123_v34 = vld [vmem:[%s3617_s0 + $0x65] sm:$0x1] }
  0x80   :  { %v868_v9 = vsel %vm791_vm6, %v867_v18, %v766_v33  ;;  %v877_v13 = vrot.slane %v772_v30, 2  ;;  %v64_v52 = vld [vmem:[%s3617_s0 + $0x6e] sm:$0x1]  ;;  %v65_v19 = vld [vmem:[%s3617_s0 + $0x70] sm:$0x1]  ;;  %v858_v18 = vsel %vm797_vm8, %v857_v0, %v856_v7  ;;  %v879_v62 = vrot.slane %v773_v26, 1 }
  0x81   :  { %v124_v23 = vld [vmem:[%s3617_s0 + $0x67] sm:$0x1]  ;;  %v125_v63 = vld [vmem:[%s3617_s0 + $0x69] sm:$0x1]  ;;  %v870_v30 = vsel %vm794_vm7, %v869_v49, %v868_v9  ;;  %v66_v33 = vld [vmem:[%s3617_s0 + $0x72] sm:$0x1]  ;;  %v3017_v26 = vmax.f32 %v57_v28, %v121_v39  ;;  %v860_v9 = vsel %vm800_vm9, %v859_v55, %v858_v18  ;;  %v3036_v39 = vmax.f32 %v58_v27, %v122_v2 }
  0x82   :  { %v67_v44 = vld [vmem:[%s3617_s0 + $0x74] sm:$0x1]  ;;  %v68_v58 = vld [vmem:[%s3617_s0 + $0x76] sm:$0x1]  ;;  %v126_v11 = vld [vmem:[%s3617_s0 + $0x6b] sm:$0x1]  ;;  %v872_v7 = vsel %vm797_vm8, %v871_v50, %v870_v30  ;;  %v3038_v50 = vmax.f32 %v59_v40, %v123_v34  ;;  %v862_v18 = vsel %vm803_vm10, %v861_v41, %v860_v9  ;;  %v188_v27 = vmax.f32 %v60_v10, %v124_v23 }
  0x83   :  { %v127_v0 = vld [vmem:[%s3617_s0 + $0x6d] sm:$0x1]  ;;  %v69_v49 = vld [vmem:[%s3617_s0 + $0x78] sm:$0x1]  ;;  %v70_v56 = vld [vmem:[%s3617_s0 + $0x7a] sm:$0x1]  ;;  %v874_v30 = vsel %vm800_vm9, %v873_v4, %v872_v7  ;;  %v189_v2 = vmax.f32 %v61_v1, %v125_v63  ;;  %v864_v40 = vsel %vm806_vm11, %v863_v45, %v862_v18  ;;  %v190_v7 = vmax.f32 %v62_v25, %v126_v11 }
  0x84   :  { %v71_v53 = vld [vmem:[%s3617_s0 + $0x7c] sm:$0x1]  ;;  %v128_v28 = vld [vmem:[%s3617_s0 + $0x6f] sm:$0x1]  ;;  %v129_v55 = vld [vmem:[%s3617_s0 + $0x71] sm:$0x1]  ;;  %v876_v41 = vsel %vm803_vm10, %v875_v12, %v874_v30  ;;  %v191_v17 = vmax.f32 %v63_v32, %v127_v0  ;;  %v866_v10 = vsel %vm809_vm12, %v865_v37, %v864_v40  ;;  %v195_v57 = vmax.f32 %v67_v44, %v131_v6 }
  0x85   :  { %v130_v8 = vld [vmem:[%s3617_s0 + $0x73] sm:$0x1]  ;;  %v133_v4 = vld [vmem:[%s3617_s0 + $0x79] sm:$0x1]  ;;  %v134_v34 = vld [vmem:[%s3617_s0 + $0x7b] sm:$0x1]  ;;  %v878_v45 = vsel %vm806_vm11, %v877_v13, %v876_v41  ;;  %v192_v23 = vmax.f32 %v64_v52, %v128_v28  ;;  %v193_v63 = vmax.f32 %v65_v19, %v129_v55  ;;  %v196_v11 = vmax.f32 %v68_v58, %v132_v16 }
  0x86   :  { %v135_v9 = vld [vmem:[%s3617_s0 + $0x7d] sm:$0x1]  ;;  %v72_v1 = vld [vmem:[%s3617_s0 + $0x7e] sm:$0x1]  ;;  %v136_v12 = vld [vmem:[%s3617_s0 + $0x7f] sm:$0x1]  ;;  %v880_v18 = vsel %vm809_vm12, %v879_v62, %v878_v45  ;;  %v194_v30 = vmax.f32 %v66_v33, %v130_v8  ;;  %v197_v32 = vmax.f32 %v69_v49, %v133_v4  ;;  %v198_v37 = vmax.f32 %v70_v56, %v134_v34 }
  0x87   :  { %v911_v25 = vpack.c.b16 %v880_v18, %v866_v10  ;;  %v199_v0 = vmax.f32 %v71_v53, %v135_v9  ;;  %v200_v13 = vmax.f32 %v72_v1, %v136_v12  ;;  %v3073_v40 = vpack.c.bf16 %v3017_v26, %v3017_v26 }
  0x88   :  { %v3077_v41 = vpack.c.bf16 %v3036_v39, %v3036_v39  ;;  %v3081_v52 = vpack.c.bf16 %v3038_v50, %v3038_v50  ;;  %v3085_v16 = vpack.c.bf16 %v188_v27, %v188_v27  ;;  %v3087_v6 = vpack.c.bf16 %v189_v2, %v189_v2 }
  0x89   :  { %3832 = vst [vmem:[#allocation95_spill] sm:$0xff] %v3073_v40  ;;  %1949 = vmatprep.mubr.msk.bf16.mxu0 %vm913_vm13, %v911_v25  ;;  %1979 = vmatprep.mubr.msk.bf16.mxu1 %vm913_vm13, %v911_v25  ;;  %v3089_v8 = vpack.c.bf16 %v190_v7, %v190_v7  ;;  %v3092_v56 = vpack.c.bf16 %v191_v17, %v191_v17  ;;  %v313_v34 = vunpack.c.l.bf16 %v3073_v40 }
  0x8a   :  { %3833 = vst [vmem:[#allocation96_spill] sm:$0xff] %v3077_v41  ;;  %3834 = vst [vmem:[#allocation97_spill] sm:$0xff] %v3081_v52  ;;  %v3094_v58 = vpack.c.bf16 %v192_v23, %v192_v23  ;;  %v3096_v19 = vpack.c.bf16 %v193_v63, %v193_v63  ;;  %v3098_v62 = vpack.c.bf16 %v194_v30, %v194_v30  ;;  %v314_v9 = vunpack.c.l.bf16 %v3077_v41 }
  0x8b   :  { %3835 = vst [vmem:[#allocation98_spill] sm:$0xff] %v3085_v16  ;;  %3836 = vst [vmem:[#allocation99_spill] sm:$0xff] %v3087_v6  ;;  %v3100_v33 = vpack.c.bf16 %v195_v57, %v195_v57  ;;  %v3102_v44 = vpack.c.bf16 %v196_v11, %v196_v11  ;;  %v3104_v49 = vpack.c.bf16 %v197_v32, %v197_v32  ;;  %v315_v10 = vunpack.c.l.bf16 %v3081_v52 }
  0x8c   :  { %3837 = vst [vmem:[#allocation100_spill] sm:$0xff] %v3089_v8  ;;  %3838 = vst [vmem:[#allocation101_spill] sm:$0xff] %v3092_v56  ;;  %v3106_v28 = vpack.c.bf16 %v198_v37, %v198_v37  ;;  %v3108_v55 = vpack.c.bf16 %v199_v0, %v199_v0  ;;  %v3110_v4 = vpack.c.bf16 %v200_v13, %v200_v13  ;;  %v316_v45 = vunpack.c.l.bf16 %v3085_v16 }
  0x8d   :  { %3839 = vst [vmem:[#allocation102_spill] sm:$0xff] %v3094_v58  ;;  %3840 = vst [vmem:[#allocation103_spill] sm:$0xff] %v3098_v62  ;;  %v317_v1 = vunpack.c.l.bf16 %v3087_v6  ;;  %v318_v12 = vunpack.c.l.bf16 %v3089_v8  ;;  %v319_v18 = vunpack.c.l.bf16 %v3092_v56  ;;  %v320_v25 = vunpack.c.l.bf16 %v3094_v58 }
  0x8e   :  { %3841 = vst [vmem:[#allocation104_spill] sm:$0xff] %v3100_v33  ;;  %3842 = vst [vmem:[#allocation105_spill] sm:$0xff] %v3102_v44  ;;  %v321_v53 = vunpack.c.l.bf16 %v3096_v19  ;;  %v322_v51 = vunpack.c.l.bf16 %v3098_v62  ;;  %v323_v40 = vunpack.c.l.bf16 %v3100_v33  ;;  %v324_v41 = vunpack.c.l.bf16 %v3102_v44 }
  0x8f   :  { %3843 = vst [vmem:[#allocation106_spill] sm:$0xff] %v3104_v49  ;;  %3844 = vst [vmem:[#allocation107_spill] sm:$0xff] %v3106_v28  ;;  %v325_v52 = vunpack.c.l.bf16 %v3104_v49  ;;  %v326_v16 = vunpack.c.l.bf16 %v3106_v28  ;;  %v327_v6 = vunpack.c.l.bf16 %v3108_v55  ;;  %v328_v8 = vunpack.c.l.bf16 %v3110_v4 }
  0x90   :  { %3845 = vst [vmem:[#allocation108_spill] sm:$0xff] %v3108_v55  ;;  %3846 = vst [vmem:[#allocation109_spill] sm:$0xff] %v3110_v4  ;;  %v3129_v56 = vsub.f32 %v3017_v26, %v313_v34  ;;  %v3132_v58 = vsub.f32 %v3036_v39, %v314_v9  ;;  %v3135_v62 = vsub.f32 %v3038_v50, %v315_v10 }
  0x91   :  { %v3137_v33 = vsub.f32 %v188_v27, %v316_v45  ;;  %v3139_v44 = vsub.f32 %v189_v2, %v317_v1  ;;  %v3141_v49 = vsub.f32 %v190_v7, %v318_v12  ;;  %v3143_v28 = vsub.f32 %v191_v17, %v319_v18 }
  0x92   :  { %3847 = vst [vmem:[#allocation110_spill] sm:$0xff] %v3129_v56  ;;  %3848 = vst [vmem:[#allocation111_spill] sm:$0xff] %v3132_v58  ;;  %v3145_v55 = vsub.f32 %v192_v23, %v320_v25  ;;  %v3147_v4 = vsub.f32 %v193_v63, %v321_v53  ;;  %v3149_v26 = vsub.f32 %v194_v30, %v322_v51 }
  0x93   :  { %3849 = vst [vmem:[#allocation112_spill] sm:$0xff] %v3135_v62  ;;  %3850 = vst [vmem:[#allocation113_spill] sm:$0xff] %v3137_v33  ;;  %v3151_v34 = vsub.f32 %v195_v57, %v323_v40  ;;  %v3153_v39 = vsub.f32 %v196_v11, %v324_v41  ;;  %v3155_v50 = vsub.f32 %v197_v32, %v325_v52 }
  0x94   :  { %3851 = vst [vmem:[#allocation114_spill] sm:$0xff] %v3139_v44  ;;  %3852 = vst [vmem:[#allocation115_spill] sm:$0xff] %v3141_v49  ;;  %v3157_v27 = vsub.f32 %v198_v37, %v326_v16  ;;  %v3159_v2 = vsub.f32 %v199_v0, %v327_v6  ;;  %v3161_v7 = vsub.f32 %v200_v13, %v328_v8 }
  0x95   :  { %3853 = vst [vmem:[#allocation116_spill] sm:$0xff] %v3143_v28  ;;  %3854 = vst [vmem:[#allocation117_spill] sm:$0xff] %v3145_v55  ;;  %v3165_v17 = vpack.c.bf16 %v3129_v56, %v3129_v56  ;;  %v3169_v51 = vpack.c.bf16 %v3132_v58, %v3132_v58  ;;  %v3173_v57 = vpack.c.bf16 %v3135_v62, %v3135_v62 }
  0x96   :  { %3855 = vst [vmem:[#allocation118_spill] sm:$0xff] %v3147_v4  ;;  %3856 = vst [vmem:[#allocation119_spill] sm:$0xff] %v3149_v26  ;;  %v3177_v23 = vpack.c.bf16 %v3137_v33, %v3137_v33  ;;  %v3181_v63 = vpack.c.bf16 %v3139_v44, %v3139_v44  ;;  %v3185_v30 = vpack.c.bf16 %v3141_v49, %v3141_v49 }
  0x97   :  { %3857 = vst [vmem:[#allocation120_spill] sm:$0xff] %v3151_v34  ;;  %3858 = vst [vmem:[#allocation121_spill] sm:$0xff] %v3153_v39  ;;  %v3189_v11 = vpack.c.bf16 %v3143_v28, %v3143_v28  ;;  %v3193_v32 = vpack.c.bf16 %v3145_v55, %v3145_v55  ;;  %v3197_v37 = vpack.c.bf16 %v3147_v4, %v3147_v4  ;;  %v774_v8 = vunpack.c.l.b16 %v3165_v17 }
  0x98   :  { %3859 = vst [vmem:[#allocation122_spill] sm:$0xff] %v3155_v50  ;;  %3860 = vst [vmem:[#allocation123_spill] sm:$0xff] %v3157_v27  ;;  %v3201_v0 = vpack.c.bf16 %v3149_v26, %v3149_v26  ;;  %v3205_v13 = vpack.c.bf16 %v3151_v34, %v3151_v34  ;;  %v3209_v40 = vpack.c.bf16 %v3153_v39, %v3153_v39  ;;  %v775_v53 = vunpack.c.l.b16 %v3169_v51 }
  0x99   :  { %3861 = vst [vmem:[#allocation124_spill] sm:$0xff] %v3159_v2  ;;  %3862 = vst [vmem:[#allocation125_spill] sm:$0xff] %v3161_v7  ;;  %v3213_v41 = vpack.c.bf16 %v3155_v50, %v3155_v50  ;;  %v3217_v52 = vpack.c.bf16 %v3157_v27, %v3157_v27  ;;  %v3221_v16 = vpack.c.bf16 %v3159_v2, %v3159_v2  ;;  %v776_v9 = vunpack.c.l.b16 %v3173_v57 }
  0x9a   :  { %3863 = vst [vmem:[#allocation126_spill] sm:$0xff] %v3201_v0  ;;  %3864 = vst [vmem:[#allocation127_spill] sm:$0xff] %v3205_v13  ;;  %v3225_v6 = vpack.c.bf16 %v3161_v7, %v3161_v7  ;;  %v777_v10 = vunpack.c.l.b16 %v3177_v23  ;;  %v778_v45 = vunpack.c.l.b16 %v3181_v63  ;;  %v779_v1 = vunpack.c.l.b16 %v3185_v30 }
  0x9b   :  { %3865 = vst [vmem:[#allocation128_spill] sm:$0xff] %v3209_v40  ;;  %3866 = vst [vmem:[#allocation129_spill] sm:$0xff] %v3213_v41  ;;  %v780_v12 = vunpack.c.l.b16 %v3189_v11  ;;  %v781_v18 = vunpack.c.l.b16 %v3193_v32  ;;  %v782_v25 = vunpack.c.l.b16 %v3197_v37  ;;  %v783_v7 = vunpack.c.l.b16 %v3201_v0 }
  0x9c   :  { %3867 = vst [vmem:[#allocation130_spill] sm:$0xff] %v3217_v52  ;;  %3868 = vst [vmem:[#allocation131_spill] sm:$0xff] %v3221_v16  ;;  %v784_v2 = vunpack.c.l.b16 %v3205_v13  ;;  %v785_v27 = vunpack.c.l.b16 %v3209_v40  ;;  %v786_v4 = vunpack.c.l.b16 %v3213_v41  ;;  %v787_v50 = vunpack.c.l.b16 %v3217_v52 }
  0x9d   :  { %3869 = vst [vmem:[#allocation132_spill] sm:$0xff] %v3225_v6  ;;  %v788_v39 = vunpack.c.l.b16 %v3221_v16  ;;  %v789_v34 = vunpack.c.l.b16 %v3225_v6  ;;  %v881_v26 = vrot.slane %v775_v53, 7  ;;  %v883_v55 = vrot.slane %v776_v9, 6 }
  0x9e   :  { %v885_v28 = vrot.slane %v777_v10, 5  ;;  %v887_v49 = vrot.slane %v778_v45, 4  ;;  %v889_v44 = vrot.slane %v779_v1, 3  ;;  %v891_v33 = vrot.slane %v780_v12, 2  ;;  %v3877_v1 = vld [vmem:[#allocation11_spill] sm:$0xff] }
  0x9f   :  { %v882_v62 = vsel %vm791_vm6, %v881_v26, %v774_v8  ;;  %v893_v58 = vrot.slane %v781_v18, 1  ;;  %v895_v56 = vrot.slane %v783_v7, 7  ;;  %v897_v13 = vrot.slane %v784_v2, 6  ;;  %v3876_v8 = vld [vmem:[#allocation10_spill] sm:$0xff]  ;;  %v3878_v18 = vld [vmem:[#allocation12_spill] sm:$0xff] }
  0xa0   :  { %v884_v40 = vsel %vm794_vm7, %v883_v55, %v882_v62  ;;  %v899_v41 = vrot.slane %v785_v27, 5  ;;  %v901_v0 = vrot.slane %v786_v4, 4  ;;  %v903_v52 = vrot.slane %v787_v50, 3  ;;  %v3870_v4 = vld [vmem:[#allocation4_spill] sm:$0xff]  ;;  %v3872_v50 = vld [vmem:[#allocation6_spill] sm:$0xff] }
  0xa1   :  { %v886_v16 = vsel %vm797_vm8, %v885_v28, %v884_v40  ;;  %v896_v6 = vsel %vm791_vm6, %v895_v56, %v782_v25  ;;  %v905_v53 = vrot.slane %v788_v39, 2  ;;  %v907_v9 = vrot.slane %v789_v34, 1  ;;  %v3871_v39 = vld [vmem:[#allocation5_spill] sm:$0xff]  ;;  %v3874_v40 = vld [vmem:[#allocation8_spill] sm:$0xff] }
  0xa2   :  { %v888_v10 = vsel %vm800_vm9, %v887_v49, %v886_v16  ;;  %v898_v45 = vsel %vm794_vm7, %v897_v13, %v896_v6  ;;  %v1057_v26 = vunpack.c.l.b16 %v2171_v54  ;;  %v1058_v7 = vunpack.c.l.b16 %v2179_v59  ;;  %v3873_v13 = vld [vmem:[#allocation7_spill] sm:$0xff]  ;;  %v3875_v16 = vld [vmem:[#allocation9_spill] sm:$0xff] }
  0xa3   :  { %v890_v2 = vsel %vm803_vm10, %v889_v44, %v888_v10  ;;  %v900_v62 = vsel %vm797_vm8, %v899_v41, %v898_v45  ;;  %v1059_v55 = vunpack.c.l.b16 %v2181_v61  ;;  %v1060_v28 = vunpack.c.l.b16 %v3870_v4  ;;  %v3879_v10 = vld [vmem:[#allocation13_spill] sm:$0xff]  ;;  %v3880_v45 = vld [vmem:[#allocation14_spill] sm:$0xff] }
  0xa4   :  { %v892_v56 = vsel %vm806_vm11, %v891_v33, %v890_v2  ;;  %v902_v34 = vsel %vm800_vm9, %v901_v0, %v900_v62  ;;  %v1061_v49 = vunpack.c.l.b16 %v3871_v39  ;;  %v1062_v27 = vunpack.c.l.b16 %v3872_v50 }
  0xa5   :  { %v894_v54 = vsel %vm809_vm12, %v893_v58, %v892_v56  ;;  %v904_v59 = vsel %vm803_vm10, %v903_v52, %v902_v34  ;;  %v1063_v44 = vunpack.c.l.b16 %v3873_v13  ;;  %v1064_v41 = vunpack.c.l.b16 %v3874_v40 }
  0xa6   :  { %v906_v61 = vsel %vm806_vm11, %v905_v53, %v904_v59  ;;  %v1065_v6 = vunpack.c.l.b16 %v3875_v16  ;;  %v1066_v33 = vunpack.c.l.b16 %v3876_v8  ;;  %v1067_v0 = vunpack.c.l.b16 %v3877_v1 }
  0xa7   :  { %v908_v12 = vsel %vm809_vm12, %v907_v9, %v906_v61  ;;  %v1068_v25 = vunpack.c.l.b16 %v3878_v18  ;;  %v1069_v58 = vunpack.c.l.b16 %v3879_v10  ;;  %v1070_v52 = vunpack.c.l.b16 %v3880_v45  ;;  %v3882_v9 = vld [vmem:[#allocation3_spill] sm:$0xff]  ;;  %v3885_v10 = vld [vmem:[#allocation32_spill] sm:$0xff] }
  0xa8   :  { %v912_v2 = vpack.c.b16 %v908_v12, %v894_v54  ;;  %v3881_v62 = vunpack.c.l.b16 %v2160_v47  ;;  %v1121_v56 = vrot.slane %v1057_v26, 6  ;;  %v1123_v53 = vrot.slane %v1058_v7, 5 }
  0xa9   :  { %v1125_v34 = vrot.slane %v1059_v55, 4  ;;  %v1127_v39 = vrot.slane %v1060_v28, 3  ;;  %v1129_v50 = vrot.slane %v1061_v49, 2  ;;  %v1131_v59 = vrot.slane %v1062_v27, 1  ;;  %v3884_v27 = vld [vmem:[#allocation31_spill] sm:$0xff] }
  0xaa   :  { %v1119_v4 = vrot.slane %v3881_v62, 7  ;;  %1950 = vmatmul.mubr.msk.bf16.gmra.mrb[4].mxu0 %vm913_vm13, %v912_v2  ;;  %1980 = vmatmul.mubr.msk.bf16.gmra.mrb[4].mxu1 %vm913_vm13, %v912_v2  ;;  %v3883_v13 = vunpack.c.l.b16 %v3882_v9  ;;  %v1133_v61 = vrot.slane %v1064_v41, 7  ;;  %v1135_v16 = vrot.slane %v1065_v6, 6  ;;  %v3886_v6 = vld [vmem:[#allocation33_spill] sm:$0xff]  ;;  %v3888_v2 = vld [vmem:[#allocation35_spill] sm:$0xff] }
  0xab   :  { %v1137_v54 = vrot.slane %v1066_v33, 5  ;;  %v1139_v8 = vrot.slane %v1067_v0, 4  ;;  %v1141_v26 = vrot.slane %v1068_v25, 3  ;;  %v1143_v7 = vrot.slane %v1069_v58, 2  ;;  %v3887_v25 = vld [vmem:[#allocation34_spill] sm:$0xff] }
  0xac   :  { %v1120_v40 = vsel %vm791_vm6, %v1119_v4, %v3883_v13  ;;  %v1134_v28 = vsel %vm791_vm6, %v1133_v61, %v1063_v44  ;;  %v1145_v49 = vrot.slane %v1070_v52, 1  ;;  %v1071_v1 = vunpack.c.l.b16 %v3884_v27  ;;  %v3889_v4 = vld [vmem:[#allocation36_spill] sm:$0xff]  ;;  %v3892_v61 = vld [vmem:[#allocation39_spill] sm:$0xff]  ;;  %v3895_v27 = vld [vmem:[#allocation42_spill] sm:$0xff] }
  0xad   :  { %v1122_v47 = vsel %vm794_vm7, %v1121_v56, %v1120_v40  ;;  %v1136_v18 = vsel %vm794_vm7, %v1135_v16, %v1134_v28  ;;  %v1072_v41 = vunpack.c.l.b16 %v3885_v10  ;;  %v1073_v33 = vunpack.c.l.b16 %v3886_v6  ;;  %v3891_v40 = vld [vmem:[#allocation38_spill] sm:$0xff]  ;;  %v3894_v28 = vld [vmem:[#allocation41_spill] sm:$0xff]  ;;  %v3897_v6 = vld [vmem:[#allocation44_spill] sm:$0xff] }
  0xae   :  { %v1124_v55 = vsel %vm797_vm8, %v1123_v53, %v1122_v47  ;;  %v1138_v0 = vsel %vm797_vm8, %v1137_v54, %v1136_v18  ;;  %v1074_v58 = vunpack.c.l.b16 %v3887_v25  ;;  %v1075_v62 = vunpack.c.l.b16 %v3888_v2  ;;  %v3890_v53 = vld [vmem:[#allocation37_spill] sm:$0xff]  ;;  %v3893_v47 = vld [vmem:[#allocation40_spill] sm:$0xff]  ;;  %v3896_v18 = vld [vmem:[#allocation43_spill] sm:$0xff] }
  0xaf   :  { %v1126_v12 = vsel %vm800_vm9, %v1125_v34, %v1124_v55  ;;  %v1140_v52 = vsel %vm800_vm9, %v1139_v8, %v1138_v0  ;;  %v1076_v56 = vunpack.c.l.b16 %v3889_v4  ;;  %v1077_v34 = vunpack.c.l.b16 %v3890_v53  ;;  %v3899_v25 = vld [vmem:[#allocation46_spill] sm:$0xff] }
  0xb0   :  { %v1128_v45 = vsel %vm803_vm10, %v1127_v39, %v1126_v12  ;;  %v1142_v13 = vsel %vm803_vm10, %v1141_v26, %v1140_v52  ;;  %v1078_v39 = vunpack.c.l.b16 %v3891_v40  ;;  %v1079_v16 = vunpack.c.l.b16 %v3892_v61 }
  0xb1   :  { %v1130_v44 = vsel %vm806_vm11, %v1129_v50, %v1128_v45  ;;  %v1144_v54 = vsel %vm806_vm11, %v1143_v7, %v1142_v13  ;;  %v1080_v55 = vunpack.c.l.b16 %v3893_v47  ;;  %v1081_v50 = vunpack.c.l.b16 %v3894_v28  ;;  %v3898_v45 = vld [vmem:[#allocation45_spill] sm:$0xff] }
  0xb2   :  { %v1132_v9 = vsel %vm809_vm12, %v1131_v59, %v1130_v44  ;;  %v1082_v8 = vunpack.c.l.b16 %v3895_v27  ;;  %v1146_v12 = vsel %vm809_vm12, %v1145_v49, %v1144_v54  ;;  %v1083_v10 = vunpack.c.l.b16 %v3896_v18 }
  0xb3   :  { %v1084_v59 = vunpack.c.l.b16 %v3897_v6  ;;  %v1085_v26 = vunpack.c.l.b16 %v3898_v45  ;;  %v1231_v0 = vpack.c.b16 %v1146_v12, %v1132_v9  ;;  %v1086_v2 = vunpack.c.l.b16 %v3899_v25 }
  0xb4   :  { %v1147_v44 = vrot.slane %v1072_v41, 7  ;;  %v1149_v52 = vrot.slane %v1073_v33, 6  ;;  %v1151_v7 = vrot.slane %v1074_v58, 5  ;;  %v1153_v4 = vrot.slane %v1075_v62, 4 }
  0xb5   :  { %v1155_v53 = vrot.slane %v1076_v56, 3  ;;  %v1157_v13 = vrot.slane %v1077_v34, 2  ;;  %1955 = vmatprep.mubr.msk.bf16.mxu0 %vm913_vm13, %v1231_v0  ;;  %1985 = vmatprep.mubr.msk.bf16.mxu1 %vm913_vm13, %v1231_v0  ;;  %v1159_v40 = vrot.slane %v1078_v39, 1  ;;  %v1161_v61 = vrot.slane %v1080_v55, 7 }
  0xb6   :  { %v1148_v49 = vsel %vm791_vm6, %v1147_v44, %v1071_v1  ;;  %v1163_v54 = vrot.slane %v1081_v50, 6  ;;  %v1165_v9 = vrot.slane %v1082_v8, 5  ;;  %v1167_v28 = vrot.slane %v1083_v10, 4 }
  0xb7   :  { %v1150_v47 = vsel %vm794_vm7, %v1149_v52, %v1148_v49  ;;  %v1169_v27 = vrot.slane %v1084_v59, 3  ;;  %v1162_v33 = vsel %vm791_vm6, %v1161_v61, %v1079_v16  ;;  %v1171_v58 = vrot.slane %v1085_v26, 2 }
  0xb8   :  { %v1152_v41 = vsel %vm797_vm8, %v1151_v7, %v1150_v47  ;;  %v1173_v62 = vrot.slane %v1086_v2, 1  ;;  %v1164_v34 = vsel %vm794_vm7, %v1163_v54, %v1162_v33  ;;  %v1087_v1 = vunpack.c.l.b16 %v2795_v48 }
  0xb9   :  { %v1154_v56 = vsel %vm800_vm9, %v1153_v4, %v1152_v41  ;;  %v1088_v39 = vunpack.c.l.b16 %v2797_v43  ;;  %v1166_v50 = vsel %vm797_vm8, %v1165_v9, %v1164_v34  ;;  %v1089_v8 = vunpack.c.l.b16 %v2799_v22 }
  0xba   :  { %v1156_v55 = vsel %vm803_vm10, %v1155_v53, %v1154_v56  ;;  %v1090_v12 = vunpack.c.l.b16 %v2801_v21  ;;  %v1168_v18 = vsel %vm800_vm9, %v1167_v28, %v1166_v50  ;;  %v1091_v10 = vunpack.c.l.b16 %v2803_v14  ;;  %v3903_v56 = vld [vmem:[#allocation97_spill] sm:$0xff] }
  0xbb   :  { %v1158_v16 = vsel %vm806_vm11, %v1157_v13, %v1156_v55  ;;  %v1092_v6 = vunpack.c.l.b16 %v2805_v24  ;;  %v1170_v43 = vsel %vm803_vm10, %v1169_v27, %v1168_v18  ;;  %v1093_v59 = vunpack.c.l.b16 %v2807_v60  ;;  %v3901_v27 = vld [vmem:[#allocation95_spill] sm:$0xff]  ;;  %v3904_v55 = vld [vmem:[#allocation98_spill] sm:$0xff] }
  0xbc   :  { %v1160_v48 = vsel %vm809_vm12, %v1159_v40, %v1158_v16  ;;  %v1094_v45 = vunpack.c.l.b16 %v2809_v3  ;;  %v1172_v22 = vsel %vm806_vm11, %v1171_v58, %v1170_v43  ;;  %v1095_v21 = vunpack.c.l.b16 %v2811_v31  ;;  %v3902_v58 = vld [vmem:[#allocation96_spill] sm:$0xff] }
  0xbd   :  { %v1096_v26 = vunpack.c.l.b16 %v2813_v42  ;;  %v1097_v0 = vunpack.c.l.b16 %v2815_v38  ;;  %v1174_v14 = vsel %vm809_vm12, %v1173_v62, %v1172_v22  ;;  %v1098_v24 = vunpack.c.l.b16 %v2817_v5 }
  0xbe   :  { %v1099_v25 = vunpack.c.l.b16 %v2819_v29  ;;  %v1100_v2 = vunpack.c.l.b16 %v2821_v46  ;;  %v1232_v44 = vpack.c.b16 %v1174_v14, %v1160_v48  ;;  %v1101_v60 = vunpack.c.l.b16 %v2823_v35  ;;  %v3907_v48 = vld [vmem:[#allocation101_spill] sm:$0xff] }
  0xbf   :  { %v1102_v3 = vunpack.c.l.b16 %v2825_v36  ;;  %v1175_v52 = vrot.slane %v1088_v39, 7  ;;  %v1177_v7 = vrot.slane %v1089_v8, 6  ;;  %v1179_v31 = vrot.slane %v1090_v12, 5  ;;  %v3905_v8 = vld [vmem:[#allocation99_spill] sm:$0xff] }
  0xc0   :  { %v1181_v4 = vrot.slane %v1091_v10, 4  ;;  %v1183_v42 = vrot.slane %v1092_v6, 3  ;;  %1956 = vmatmul.mubr.msk.bf16.vlgmr.msra.gmra.mrb[0].mxu0 %vm913_vm13, %v1232_v44  ;;  %1986 = vmatmul.mubr.msk.bf16.vlgmr.msra.gmra.mrb[0].mxu1 %vm913_vm13, %v1232_v44  ;;  %v1185_v5 = vrot.slane %v1093_v59, 2  ;;  %v1187_v29 = vrot.slane %v1094_v45, 1  ;;  %v3906_v10 = vld [vmem:[#allocation100_spill] sm:$0xff]  ;;  %v3908_v45 = vld [vmem:[#allocation102_spill] sm:$0xff] }
  0xc1   :  { %v1176_v38 = vsel %vm791_vm6, %v1175_v52, %v1087_v1  ;;  %v1189_v53 = vrot.slane %v1096_v26, 7  ;;  %1964 = vmatpush3.bf16.msk.msra.mxu0 %vm2074_vm2, %v3799_v20  ;;  %1994 = vmatpush3.bf16.msk.msra.mxu1 %vm2113_vm5, %v3799_v20  ;;  %v1191_v36 = vrot.slane %v1097_v0, 6  ;;  %v1193_v13 = vrot.slane %v1098_v24, 5  ;;  %v3909_v26 = vld [vmem:[#allocation103_spill] sm:$0xff]  ;;  %v3910_v24 = vld [vmem:[#allocation104_spill] sm:$0xff] }
  0xc2   :  { %v1178_v35 = vsel %vm794_vm7, %v1177_v7, %v1176_v38  ;;  %v1195_v49 = vrot.slane %v1099_v25, 4  ;;  %v1197_v54 = vrot.slane %v1100_v2, 3  ;;  %v1199_v47 = vrot.slane %v1101_v60, 2  ;;  %v3911_v2 = vld [vmem:[#allocation105_spill] sm:$0xff]  ;;  %v3912_v60 = vld [vmem:[#allocation106_spill] sm:$0xff]  ;;  %v3913_v7 = vld [vmem:[#allocation107_spill] sm:$0xff] }
  0xc3   :  { %v1180_v40 = vsel %vm797_vm8, %v1179_v31, %v1178_v35  ;;  %v1190_v61 = vsel %vm791_vm6, %v1189_v53, %v1095_v21  ;;  %v1201_v28 = vrot.slane %v1102_v3, 1  ;;  %v1103_v41 = vunpack.c.l.b16 %v3901_v27  ;;  %v3915_v38 = vld [vmem:[#allocation109_spill] sm:$0xff] }
  0xc4   :  { %v1182_v9 = vsel %vm800_vm9, %v1181_v4, %v1180_v40  ;;  %v1192_v15 = vsel %vm794_vm7, %v1191_v36, %v1190_v61  ;;  %v1104_v62 = vunpack.c.l.b16 %v3902_v58  ;;  %v1105_v34 = vunpack.c.l.b16 %v3903_v56  ;;  %v3914_v4 = vld [vmem:[#allocation108_spill] sm:$0xff] }
  0xc5   :  { %v1184_v20 = vsel %vm803_vm10, %v1183_v42, %v1182_v9  ;;  %v1194_v33 = vsel %vm797_vm8, %v1193_v13, %v1192_v15  ;;  %v1106_v50 = vunpack.c.l.b16 %v3904_v55  ;;  %v1107_v12 = vunpack.c.l.b16 %v3905_v8  ;;  %v3918_v55 = vld [vmem:[#allocation17_spill] sm:$0xff] }
  0xc6   :  { %v1186_v1 = vsel %vm806_vm11, %v1185_v5, %v1184_v20  ;;  %v1196_v39 = vsel %vm800_vm9, %v1195_v49, %v1194_v33  ;;  %v1108_v6 = vunpack.c.l.b16 %v3906_v10  ;;  %v1109_v43 = vunpack.c.l.b16 %v3907_v48  ;;  %v3920_v10 = vld [vmem:[#allocation19_spill] sm:$0xff] }
  0xc7   :  { %v1188_v16 = vsel %vm809_vm12, %v1187_v29, %v1186_v1  ;;  %v1198_v18 = vsel %vm803_vm10, %v1197_v54, %v1196_v39  ;;  %v1110_v22 = vunpack.c.l.b16 %v3908_v45  ;;  %v1111_v21 = vunpack.c.l.b16 %v3096_v19  ;;  %v3917_v1 = vld [vmem:[#allocation16_spill] sm:$0xff] }
  0xc8   :  { %v1200_v59 = vsel %vm806_vm11, %v1199_v47, %v1198_v18  ;;  %v1112_v0 = vunpack.c.l.b16 %v3909_v26  ;;  %v1113_v25 = vunpack.c.l.b16 %v3910_v24  ;;  %v1114_v44 = vunpack.c.l.b16 %v3911_v2 }
  0xc9   :  { %v1202_v14 = vsel %vm809_vm12, %v1201_v28, %v1200_v59  ;;  %v1115_v3 = vunpack.c.l.b16 %v3912_v60  ;;  %v1116_v31 = vunpack.c.l.b16 %v3913_v7  ;;  %v1117_v42 = vunpack.c.l.b16 %v3914_v4  ;;  %v3921_v59 = vld [vmem:[#allocation20_spill] sm:$0xff] }
  0xca   :  { %v1233_v52 = vpack.c.b16 %v1202_v14, %v1188_v16  ;;  %v1118_v5 = vunpack.c.l.b16 %v3915_v38  ;;  %v1203_v29 = vrot.slane %v1104_v62, 7  ;;  %v1205_v53 = vrot.slane %v1105_v34, 6  ;;  %v3916_v62 = vld [vmem:[#allocation15_spill] sm:$0xff]  ;;  %v3919_v16 = vld [vmem:[#allocation18_spill] sm:$0xff]  ;;  %v3925_v60 = vld [vmem:[#allocation24_spill] sm:$0xff] }
  0xcb   :  { %v1207_v19 = vrot.slane %v1106_v50, 5  ;;  %v1209_v46 = vrot.slane %v1107_v12, 4  ;;  %v1211_v35 = vrot.slane %v1108_v6, 3  ;;  %v1213_v36 = vrot.slane %v1109_v43, 2  ;;  %v3923_v14 = vld [vmem:[#allocation22_spill] sm:$0xff]  ;;  %v3928_v38 = vld [vmem:[#allocation27_spill] sm:$0xff] }
  0xcc   :  { %1959 = vmatprep.mubr.msk.bf16.mxu0 %vm913_vm13, %v1233_v52  ;;  %1989 = vmatprep.mubr.msk.bf16.mxu1 %vm913_vm13, %v1233_v52  ;;  %v1215_v13 = vrot.slane %v1110_v22, 1  ;;  %v1217_v49 = vrot.slane %v1112_v0, 7  ;;  %v1204_v40 = vsel %vm791_vm6, %v1203_v29, %v1103_v41  ;;  %v1219_v61 = vrot.slane %v1113_v25, 6  ;;  %v3922_v22 = vld [vmem:[#allocation21_spill] sm:$0xff]  ;;  %v3924_v25 = vld [vmem:[#allocation23_spill] sm:$0xff]  ;;  %v3929_v29 = vld [vmem:[#allocation28_spill] sm:$0xff] }
  0xcd   :  { %v1221_v54 = vrot.slane %v1114_v44, 5  ;;  %v1223_v47 = vrot.slane %v1115_v3, 4  ;;  %v1206_v9 = vsel %vm794_vm7, %v1205_v53, %v1204_v40  ;;  %v1225_v28 = vrot.slane %v1116_v31, 3  ;;  %v3926_v52 = vld [vmem:[#allocation25_spill] sm:$0xff]  ;;  %v3927_v31 = vld [vmem:[#allocation26_spill] sm:$0xff] }
  0xce   :  { %v1218_v15 = vsel %vm791_vm6, %v1217_v49, %v1111_v21  ;;  %v1227_v27 = vrot.slane %v1117_v42, 2  ;;  %v1208_v20 = vsel %vm797_vm8, %v1207_v19, %v1206_v9  ;;  %v1229_v58 = vrot.slane %v1118_v5, 1  ;;  %v3930_v19 = vld [vmem:[#allocation29_spill] sm:$0xff] }
  0xcf   :  { %v1220_v33 = vsel %vm794_vm7, %v1219_v61, %v1218_v15  ;;  %v585_v56 = vpack.c.bf16 %v3916_v62, %v3916_v62  ;;  %v1210_v34 = vsel %vm800_vm9, %v1209_v46, %v1208_v20  ;;  %v586_v39 = vpack.c.bf16 %v3917_v1, %v3917_v1 }
  0xd0   :  { %v1222_v41 = vsel %vm797_vm8, %v1221_v54, %v1220_v33  ;;  %v587_v50 = vpack.c.bf16 %v3918_v55, %v3918_v55  ;;  %v1212_v8 = vsel %vm803_vm10, %v1211_v35, %v1210_v34  ;;  %v588_v18 = vpack.c.bf16 %v3919_v16, %v3919_v16  ;;  %v3931_v35 = vld [vmem:[#allocation30_spill] sm:$0xff] }
  0xd1   :  { %v1224_v12 = vsel %vm800_vm9, %v1223_v47, %v1222_v41  ;;  %v589_v6 = vpack.c.bf16 %v3920_v10, %v3920_v10  ;;  %v1214_v48 = vsel %vm806_vm11, %v1213_v36, %v1212_v8  ;;  %v590_v45 = vpack.c.bf16 %v3921_v59, %v3921_v59 }
  0xd2   :  { %v1226_v43 = vsel %vm803_vm10, %v1225_v28, %v1224_v12  ;;  %v591_v21 = vpack.c.bf16 %v3922_v22, %v3922_v22  ;;  %v1216_v26 = vsel %vm809_vm12, %v1215_v13, %v1214_v48  ;;  %v592_v24 = vpack.c.bf16 %v3923_v14, %v3923_v14  ;;  %v3933_v14 = vld [vmem:[#allocation48_spill] sm:$0xff] }
  0xd3   :  { %v1228_v0 = vsel %vm806_vm11, %v1227_v27, %v1226_v43  ;;  %v593_v2 = vpack.c.bf16 %v3924_v25, %v3924_v25  ;;  %v594_v3 = vpack.c.bf16 %v3925_v60, %v3925_v60  ;;  %v595_v7 = vpack.c.bf16 %v3926_v52, %v3926_v52  ;;  %v3935_v60 = vld [vmem:[#allocation49_spill] sm:$0xff] }
  0xd4   :  { %v1230_v44 = vsel %vm809_vm12, %v1229_v58, %v1228_v0  ;;  %v596_v4 = vpack.c.bf16 %v3927_v31, %v3927_v31  ;;  %v597_v5 = vpack.c.bf16 %v3928_v38, %v3928_v38  ;;  %v598_v53 = vpack.c.bf16 %v3929_v29, %v3929_v29  ;;  %v3932_v0 = vld [vmem:[#allocation47_spill] sm:$0xff]  ;;  %v3938_v31 = vld [vmem:[#allocation56_spill] sm:$0xff]  ;;  %v3940_v29 = vld [vmem:[#allocation50_spill] sm:$0xff] }
  0xd5   :  { %v1234_v42 = vpack.c.b16 %v1230_v44, %v1216_v26  ;;  %v599_v46 = vpack.c.bf16 %v3930_v19, %v3930_v19  ;;  %v600_v36 = vpack.c.bf16 %v3931_v35, %v3931_v35  ;;  %v1376_v13 = vunpack.c.l.b16 %v585_v56 }
  0xd6   :  { %v1377_v49 = vunpack.c.l.b16 %v586_v39  ;;  %v1378_v40 = vunpack.c.l.b16 %v587_v50  ;;  %v1379_v61 = vunpack.c.l.b16 %v588_v18  ;;  %v1380_v54 = vunpack.c.l.b16 %v589_v6 }
  0xd7   :  { %1960 = vmatmul.mubr.msk.bf16.gmra.mrb[4].mxu0 %vm913_vm13, %v1234_v42  ;;  %1990 = vmatmul.mubr.msk.bf16.gmra.mrb[4].mxu1 %vm913_vm13, %v1234_v42  ;;  %v1381_v47 = vunpack.c.l.b16 %v590_v45  ;;  %v1382_v9 = vunpack.c.l.b16 %v591_v21  ;;  %v1383_v15 = vunpack.c.l.b16 %v592_v24  ;;  %v1384_v28 = vunpack.c.l.b16 %v593_v2 }
  0xd8   :  { %v1385_v27 = vunpack.c.l.b16 %v594_v3  ;;  %v1386_v20 = vunpack.c.l.b16 %v595_v7  ;;  %v1387_v33 = vunpack.c.l.b16 %v596_v4  ;;  %v1388_v58 = vunpack.c.l.b16 %v597_v5  ;;  %v3937_v7 = vld [vmem:[#allocation55_spill] sm:$0xff] }
  0xd9   :  { %v1389_v62 = vunpack.c.l.b16 %v598_v53  ;;  %v1390_v34 = vunpack.c.l.b16 %v599_v46  ;;  %v1391_v41 = vunpack.c.l.b16 %v600_v36  ;;  %v1440_v56 = vrot.slane %v1377_v49, 7  ;;  %v3942_v46 = vld [vmem:[#allocation57_spill] sm:$0xff] }
  0xda   :  { %v1442_v1 = vrot.slane %v1378_v40, 6  ;;  %v1444_v39 = vrot.slane %v1379_v61, 5  ;;  %v1446_v55 = vrot.slane %v1380_v54, 4  ;;  %v1448_v50 = vrot.slane %v1381_v47, 3  ;;  %v3944_v40 = vld [vmem:[#allocation51_spill] sm:$0xff]  ;;  %v3946_v47 = vld [vmem:[#allocation58_spill] sm:$0xff] }
  0xdb   :  { %v1450_v8 = vrot.slane %v1382_v9, 2  ;;  %v1452_v12 = vrot.slane %v1383_v15, 1  ;;  %v1441_v16 = vsel %vm791_vm6, %v1440_v56, %v1376_v13  ;;  %v1454_v18 = vrot.slane %v1385_v27, 7 }
  0xdc   :  { %v1456_v10 = vrot.slane %v1386_v20, 6  ;;  %v1458_v6 = vrot.slane %v1387_v33, 5  ;;  %v1443_v48 = vsel %vm794_vm7, %v1442_v1, %v1441_v16  ;;  %v1460_v43 = vrot.slane %v1388_v58, 4  ;;  %v3948_v20 = vld [vmem:[#allocation52_spill] sm:$0xff]  ;;  %v3952_v1 = vld [vmem:[#allocation53_spill] sm:$0xff]  ;;  %v3956_v16 = vld [vmem:[#allocation79_spill] sm:$0xff] }
  0xdd   :  { %v1462_v59 = vrot.slane %v1389_v62, 3  ;;  %v1464_v45 = vrot.slane %v1390_v34, 2  ;;  %v1445_v22 = vsel %vm797_vm8, %v1444_v39, %v1443_v48  ;;  %v1455_v21 = vsel %vm791_vm6, %v1454_v18, %v1384_v28  ;;  %v3950_v62 = vld [vmem:[#allocation59_spill] sm:$0xff] }
  0xde   :  { %v1466_v26 = vrot.slane %v1391_v41, 1  ;;  %v3934_v24 = vrot.slane %v3933_v14, 7  ;;  %v1447_v2 = vsel %vm800_vm9, %v1446_v55, %v1445_v22  ;;  %v1457_v44 = vsel %vm794_vm7, %v1456_v10, %v1455_v21  ;;  %v3961_v21 = vld [vmem:[#allocation80_spill] sm:$0xff] }
  0xdf   :  { %v3936_v3 = vrot.slane %v3935_v60, 6  ;;  %v3939_v4 = vrot.slane %v3938_v31, 7  ;;  %v1449_v38 = vsel %vm803_vm10, %v1448_v50, %v1447_v2  ;;  %v1459_v5 = vsel %vm797_vm8, %v1458_v6, %v1457_v44  ;;  %v3954_v50 = vld [vmem:[#allocation60_spill] sm:$0xff]  ;;  %v3957_v6 = vld [vmem:[#allocation54_spill] sm:$0xff]  ;;  %v3964_v44 = vld [vmem:[#allocation81_spill] sm:$0xff] }
  0xe0   :  { %v1469_v25 = vsel %vm791_vm6, %v3934_v24, %v3932_v0  ;;  %v3941_v53 = vrot.slane %v3940_v29, 5  ;;  %v3943_v35 = vrot.slane %v3942_v46, 6  ;;  %v1451_v13 = vsel %vm806_vm11, %v1450_v8, %v1449_v38  ;;  %v3962_v24 = vld [vmem:[#allocation62_spill] sm:$0xff]  ;;  %v3968_v38 = vld [vmem:[#allocation85_spill] sm:$0xff] }
  0xe1   :  { %v1471_v52 = vsel %vm794_vm7, %v3936_v3, %v1469_v25  ;;  %v1483_v42 = vsel %vm791_vm6, %v3939_v4, %v3937_v7  ;;  %v1461_v49 = vsel %vm800_vm9, %v1460_v43, %v1459_v5  ;;  %v3945_v61 = vrot.slane %v3944_v40, 4  ;;  %v3965_v3 = vld [vmem:[#allocation82_spill] sm:$0xff]  ;;  %v3966_v7 = vld [vmem:[#allocation83_spill] sm:$0xff]  ;;  %v3967_v4 = vld [vmem:[#allocation84_spill] sm:$0xff] }
  0xe2   :  { %v1473_v19 = vsel %vm797_vm8, %v3941_v53, %v1471_v52  ;;  %v1485_v36 = vsel %vm794_vm7, %v3943_v35, %v1483_v42  ;;  %v3947_v9 = vrot.slane %v3946_v47, 5  ;;  %v1453_v28 = vsel %vm809_vm12, %v1452_v12, %v1451_v13  ;;  %v3969_v29 = vld [vmem:[#allocation86_spill] sm:$0xff]  ;;  %v3971_v35 = vld [vmem:[#allocation88_spill] sm:$0xff]  ;;  %v3972_v13 = vld [vmem:[#allocation89_spill] sm:$0xff] }
  0xe3   :  { %v1475_v54 = vsel %vm800_vm9, %v3945_v61, %v1473_v19  ;;  %v1463_v27 = vsel %vm803_vm10, %v1462_v59, %v1461_v49  ;;  %v3949_v33 = vrot.slane %v3948_v20, 3  ;;  %v3951_v34 = vrot.slane %v3950_v62, 4  ;;  %v3959_v59 = vld [vmem:[#allocation61_spill] sm:$0xff]  ;;  %v3970_v19 = vld [vmem:[#allocation87_spill] sm:$0xff]  ;;  %v3973_v40 = vld [vmem:[#allocation90_spill] sm:$0xff] }
  0xe4   :  { %v1487_v15 = vsel %vm797_vm8, %v3947_v9, %v1485_v36  ;;  %v1465_v56 = vsel %vm806_vm11, %v1464_v45, %v1463_v27  ;;  %v3953_v39 = vrot.slane %v3952_v1, 2  ;;  %v3955_v8 = vrot.slane %v3954_v50, 3  ;;  %v3975_v9 = vld [vmem:[#allocation92_spill] sm:$0xff]  ;;  %v3977_v20 = vld [vmem:[#allocation94_spill] sm:$0xff]  ;;  %v3982_v50 = vld [vmem:[#allocation67_spill] sm:$0xff] }
  0xe5   :  { %v1477_v58 = vsel %vm803_vm10, %v3949_v33, %v1475_v54  ;;  %v1489_v41 = vsel %vm800_vm9, %v3951_v34, %v1487_v15  ;;  %v489_v18 = vunpack.c.l.bf16 %v3956_v16  ;;  %v1467_v10 = vsel %vm809_vm12, %v1466_v26, %v1465_v56  ;;  %v3974_v54 = vld [vmem:[#allocation91_spill] sm:$0xff]  ;;  %v3979_v34 = vld [vmem:[#allocation64_spill] sm:$0xff]  ;;  %v3980_v56 = vld [vmem:[#allocation65_spill] sm:$0xff] }
  0xe6   :  { %v1479_v55 = vsel %vm806_vm11, %v3953_v39, %v1477_v58  ;;  %v1491_v12 = vsel %vm803_vm10, %v3955_v8, %v1489_v41  ;;  %v3958_v48 = vrot.slane %v3957_v6, 1  ;;  %v3960_v22 = vrot.slane %v3959_v59, 2  ;;  %v3978_v58 = vld [vmem:[#allocation63_spill] sm:$0xff]  ;;  %v3981_v39 = vld [vmem:[#allocation66_spill] sm:$0xff] }
  0xe7   :  { %v490_v0 = vunpack.c.l.bf16 %v3961_v21  ;;  %v1552_v14 = vpack.c.b16 %v1467_v10, %v1453_v28  ;;  %v3963_v25 = vrot.slane %v3962_v24, 1  ;;  %v491_v60 = vunpack.c.l.bf16 %v3964_v44  ;;  %v3976_v28 = vld [vmem:[#allocation93_spill] sm:$0xff]  ;;  %v3986_v59 = vld [vmem:[#allocation71_spill] sm:$0xff]  ;;  %v3989_v24 = vld [vmem:[#allocation74_spill] sm:$0xff] }
  0xe8   :  { %v1481_v43 = vsel %vm809_vm12, %v3958_v48, %v1479_v55  ;;  %v1493_v45 = vsel %vm806_vm11, %v3960_v22, %v1491_v12  ;;  %v492_v52 = vunpack.c.l.bf16 %v3965_v3  ;;  %v493_v31 = vunpack.c.l.bf16 %v3966_v7  ;;  %v3983_v12 = vld [vmem:[#allocation68_spill] sm:$0xff]  ;;  %v3984_v10 = vld [vmem:[#allocation69_spill] sm:$0xff]  ;;  %v3985_v48 = vld [vmem:[#allocation70_spill] sm:$0xff] }
  0xe9   :  { %v1495_v2 = vsel %vm809_vm12, %v3963_v25, %v1493_v45  ;;  %v494_v42 = vunpack.c.l.bf16 %v3967_v4  ;;  %v495_v5 = vunpack.c.l.bf16 %v3968_v38  ;;  %1965 = vmatprep.mubr.msk.bf16.mxu0 %vm913_vm13, %v1552_v14  ;;  %1995 = vmatprep.mubr.msk.bf16.mxu1 %vm913_vm13, %v1552_v14  ;;  %v496_v53 = vunpack.c.l.bf16 %v3969_v29  ;;  %v3987_v45 = vld [vmem:[#allocation72_spill] sm:$0xff]  ;;  %v3988_v14 = vld [vmem:[#allocation73_spill] sm:$0xff]  ;;  %v3990_v25 = vld [vmem:[#allocation75_spill] sm:$0xff] }
  0xea   :  { %v1553_v26 = vpack.c.b16 %v1495_v2, %v1481_v43  ;;  %v497_v46 = vunpack.c.l.bf16 %v3970_v19  ;;  %v498_v36 = vunpack.c.l.bf16 %v3971_v35  ;;  %v499_v49 = vunpack.c.l.bf16 %v3972_v13  ;;  %v3991_v44 = vld [vmem:[#allocation76_spill] sm:$0xff]  ;;  %v3992_v3 = vld [vmem:[#allocation77_spill] sm:$0xff] }
  0xeb   :  { %v500_v61 = vunpack.c.l.bf16 %v3973_v40  ;;  %v501_v47 = vunpack.c.l.bf16 %v3974_v54  ;;  %v502_v15 = vunpack.c.l.bf16 %v3975_v9  ;;  %v503_v27 = vunpack.c.l.bf16 %v3976_v28 }
  0xec   :  { %1966 = vmatmul.mubr.msk.bf16.vlgmr.msra.gmra.mrb[0].mxu0 %vm913_vm13, %v1553_v26  ;;  %1996 = vmatmul.mubr.msk.bf16.vlgmr.msra.gmra.mrb[0].mxu1 %vm913_vm13, %v1553_v26  ;;  %v504_v33 = vunpack.c.l.bf16 %v3977_v20  ;;  %v553_v62 = vsub.f32 %v3978_v58, %v489_v18  ;;  %v554_v41 = vsub.f32 %v3979_v34, %v490_v0  ;;  %v555_v1 = vsub.f32 %v3980_v56, %v491_v60  ;;  %v3993_v26 = vld [vmem:[#allocation78_spill] sm:$0xff] }
  0xed   :  { %v556_v55 = vsub.f32 %v3981_v39, %v492_v52  ;;  %v557_v8 = vsub.f32 %v3982_v50, %v493_v31  ;;  %v558_v16 = vsub.f32 %v3983_v12, %v494_v42  ;;  %v559_v6 = vsub.f32 %v3984_v10, %v495_v5 }
  0xee   :  { %v560_v43 = vsub.f32 %v3985_v48, %v496_v53  ;;  %v561_v22 = vsub.f32 %v3986_v59, %v497_v46  ;;  %v562_v21 = vsub.f32 %v3987_v45, %v498_v36  ;;  %v563_v18 = vsub.f32 %v3988_v14, %v499_v49 }
  0xef   :  { %v564_v0 = vsub.f32 %v3989_v24, %v500_v61  ;;  %v565_v2 = vsub.f32 %v3990_v25, %v501_v47  ;;  %v566_v60 = vsub.f32 %v3991_v44, %v502_v15  ;;  %v567_v52 = vsub.f32 %v3992_v3, %v503_v27 }
  0xf0   :  { %v568_v7 = vsub.f32 %v3993_v26, %v504_v33  ;;  %v617_v31 = vpack.c.bf16 %v553_v62, %v553_v62  ;;  %v618_v4 = vpack.c.bf16 %v554_v41, %v554_v41  ;;  %v619_v42 = vpack.c.bf16 %v555_v1, %v555_v1 }
  0xf1   :  { %v620_v38 = vpack.c.bf16 %v556_v55, %v556_v55  ;;  %v621_v5 = vpack.c.bf16 %v557_v8, %v557_v8  ;;  %v622_v29 = vpack.c.bf16 %v558_v16, %v558_v16  ;;  %v623_v53 = vpack.c.bf16 %v559_v6, %v559_v6 }
  0xf2   :  { %v624_v19 = vpack.c.bf16 %v560_v43, %v560_v43  ;;  %v625_v46 = vpack.c.bf16 %v561_v22, %v561_v22  ;;  %v626_v35 = vpack.c.bf16 %v562_v21, %v562_v21  ;;  %v627_v36 = vpack.c.bf16 %v563_v18, %v563_v18 }
  0xf3   :  { %v628_v13 = vpack.c.bf16 %v564_v0, %v564_v0  ;;  %v629_v49 = vpack.c.bf16 %v565_v2, %v565_v2  ;;  %v630_v40 = vpack.c.bf16 %v566_v60, %v566_v60  ;;  %v631_v61 = vpack.c.bf16 %v567_v52, %v567_v52 }
  0xf4   :  { %v632_v54 = vpack.c.bf16 %v568_v7, %v568_v7  ;;  %v1408_v47 = vunpack.c.l.b16 %v617_v31  ;;  %v1409_v9 = vunpack.c.l.b16 %v618_v4  ;;  %v1410_v15 = vunpack.c.l.b16 %v619_v42 }
  0xf5   :  { %v1411_v28 = vunpack.c.l.b16 %v620_v38  ;;  %v1412_v27 = vunpack.c.l.b16 %v621_v5  ;;  %v1413_v20 = vunpack.c.l.b16 %v622_v29  ;;  %v1414_v33 = vunpack.c.l.b16 %v623_v53 }
  0xf6   :  { %v1415_v58 = vunpack.c.l.b16 %v624_v19  ;;  %v1416_v62 = vunpack.c.l.b16 %v625_v46  ;;  %v1417_v34 = vunpack.c.l.b16 %v626_v35  ;;  %v1418_v41 = vunpack.c.l.b16 %v627_v36  ;;  %v3994_v35 = vld [vmem:[#allocation126_spill] sm:$0xff] }
  0xf7   :  { %v1419_v56 = vunpack.c.l.b16 %v628_v13  ;;  %v1420_v1 = vunpack.c.l.b16 %v629_v49  ;;  %v1421_v39 = vunpack.c.l.b16 %v630_v40  ;;  %v1422_v55 = vunpack.c.l.b16 %v631_v61  ;;  %v3995_v13 = vld [vmem:[#allocation127_spill] sm:$0xff]  ;;  %v3996_v40 = vld [vmem:[#allocation128_spill] sm:$0xff]  ;;  %v3997_v61 = vld [vmem:[#allocation129_spill] sm:$0xff] }
  0xf8   :  { %v1423_v50 = vunpack.c.l.b16 %v632_v54  ;;  %v1496_v8 = vrot.slane %v1409_v9, 7  ;;  %v1498_v12 = vrot.slane %v1410_v15, 6  ;;  %v1500_v16 = vrot.slane %v1411_v28, 5 }
  0xf9   :  { %v1502_v10 = vrot.slane %v1412_v27, 4  ;;  %v1504_v6 = vrot.slane %v1413_v20, 3  ;;  %v1506_v48 = vrot.slane %v1414_v33, 2  ;;  %v1510_v59 = vrot.slane %v1417_v34, 7  ;;  %v4001_v20 = vld [vmem:[#allocation110_spill] sm:$0xff] }
  0xfa   :  { %v1497_v43 = vsel %vm791_vm6, %v1496_v8, %v1408_v47  ;;  %v1512_v22 = vrot.slane %v1418_v41, 6  ;;  %v1514_v45 = vrot.slane %v1419_v56, 5  ;;  %v1508_v14 = vrot.slane %v1415_v58, 1  ;;  %v3998_v47 = vld [vmem:[#allocation130_spill] sm:$0xff]  ;;  %v4004_v41 = vld [vmem:[#allocation113_spill] sm:$0xff]  ;;  %v4007_v8 = vld [vmem:[#allocation116_spill] sm:$0xff] }
  0xfb   :  { %v1499_v21 = vsel %vm794_vm7, %v1498_v12, %v1497_v43  ;;  %v1516_v18 = vrot.slane %v1420_v1, 4  ;;  %v1518_v24 = vrot.slane %v1421_v39, 3  ;;  %v1511_v25 = vsel %vm791_vm6, %v1510_v59, %v1416_v62  ;;  %v4003_v62 = vld [vmem:[#allocation112_spill] sm:$0xff]  ;;  %v4005_v1 = vld [vmem:[#allocation114_spill] sm:$0xff] }
  0xfc   :  { %v1501_v0 = vsel %vm797_vm8, %v1500_v16, %v1499_v21  ;;  %v1520_v2 = vrot.slane %v1422_v55, 2  ;;  %v1522_v44 = vrot.slane %v1423_v50, 1  ;;  %v1513_v3 = vsel %vm794_vm7, %v1512_v22, %v1511_v25  ;;  %v4006_v55 = vld [vmem:[#allocation115_spill] sm:$0xff]  ;;  %v4008_v16 = vld [vmem:[#allocation117_spill] sm:$0xff]  ;;  %v4010_v43 = vld [vmem:[#allocation120_spill] sm:$0xff] }
  0xfd   :  { %v1503_v60 = vsel %vm800_vm9, %v1502_v10, %v1501_v0  ;;  %v505_v52 = vunpack.c.l.bf16 %v3165_v17  ;;  %v506_v26 = vunpack.c.l.bf16 %v3169_v51  ;;  %v1515_v31 = vsel %vm797_vm8, %v1514_v45, %v1513_v3  ;;  %v4011_v22 = vld [vmem:[#allocation121_spill] sm:$0xff]  ;;  %v4012_v21 = vld [vmem:[#allocation122_spill] sm:$0xff]  ;;  %v4014_v0 = vld [vmem:[#allocation123_spill] sm:$0xff] }
  0xfe   :  { %v1505_v7 = vsel %vm803_vm10, %v1504_v6, %v1503_v60  ;;  %v507_v4 = vunpack.c.l.bf16 %v3173_v57  ;;  %v508_v42 = vunpack.c.l.bf16 %v3177_v23  ;;  %v1517_v5 = vsel %vm800_vm9, %v1516_v18, %v1515_v31  ;;  %v4009_v6 = vld [vmem:[#allocation119_spill] sm:$0xff]  ;;  %v4013_v18 = vld [vmem:[#allocation118_spill] sm:$0xff]  ;;  %v4016_v60 = vld [vmem:[#allocation125_spill] sm:$0xff] }
  0xff   :  { %v1507_v38 = vsel %vm806_vm11, %v1506_v48, %v1505_v7  ;;  %v509_v29 = vunpack.c.l.bf16 %v3181_v63  ;;  %v510_v53 = vunpack.c.l.bf16 %v3185_v30  ;;  %v1519_v51 = vsel %vm803_vm10, %v1518_v24, %v1517_v5 }
 0x100   :  { %v1509_v17 = vsel %vm809_vm12, %v1508_v14, %v1507_v38  ;;  %v511_v19 = vunpack.c.l.bf16 %v3189_v11  ;;  %v512_v46 = vunpack.c.l.bf16 %v3193_v32  ;;  %v1521_v57 = vsel %vm806_vm11, %v1520_v2, %v1519_v51  ;;  %v3999_v11 = vld [vmem:[#allocation131_spill] sm:$0xff]  ;;  %v4000_v32 = vld [vmem:[#allocation132_spill] sm:$0xff] }
 0x101   :  { %v513_v23 = vunpack.c.l.bf16 %v3197_v37  ;;  %v514_v36 = vunpack.c.l.bf16 %v3994_v35  ;;  %v515_v49 = vunpack.c.l.bf16 %v3995_v13  ;;  %v1523_v63 = vsel %vm809_vm12, %v1522_v44, %v1521_v57  ;;  %v4002_v37 = vld [vmem:[#allocation111_spill] sm:$0xff]  ;;  %v4015_v2 = vld [vmem:[#allocation124_spill] sm:$0xff] }
 0x102   :  { %v516_v30 = vunpack.c.l.bf16 %v3996_v40  ;;  %v517_v54 = vunpack.c.l.bf16 %v3997_v61  ;;  %v518_v9 = vunpack.c.l.bf16 %v3998_v47  ;;  %v1554_v15 = vpack.c.b16 %v1523_v63, %v1509_v17 }
 0x103   :  { %v519_v28 = vunpack.c.l.bf16 %v3999_v11  ;;  %v520_v27 = vunpack.c.l.bf16 %v4000_v32  ;;  %v569_v33 = vsub.f32 %v4001_v20, %v505_v52  ;;  %v570_v58 = vsub.f32 %v4002_v37, %v506_v26 }
 0x104   :  { %v571_v34 = vsub.f32 %v4003_v62, %v507_v4  ;;  %v572_v56 = vsub.f32 %v4004_v41, %v508_v42  ;;  %v573_v39 = vsub.f32 %v4005_v1, %v509_v29  ;;  %1969 = vmatprep.mubr.msk.bf16.mxu0 %vm913_vm13, %v1554_v15  ;;  %1999 = vmatprep.mubr.msk.bf16.mxu1 %vm913_vm13, %v1554_v15 }
 0x105   :  { %v574_v50 = vsub.f32 %v4006_v55, %v510_v53  ;;  %v575_v12 = vsub.f32 %v4007_v8, %v511_v19  ;;  %v576_v10 = vsub.f32 %v4008_v16, %v512_v46  ;;  %v578_v48 = vsub.f32 %v4009_v6, %v514_v36 }
 0x106   :  { %v579_v59 = vsub.f32 %v4010_v43, %v515_v49  ;;  %v580_v45 = vsub.f32 %v4011_v22, %v516_v30  ;;  %v581_v14 = vsub.f32 %v4012_v21, %v517_v54  ;;  %v577_v24 = vsub.f32 %v4013_v18, %v513_v23 }
 0x107   :  { %v582_v25 = vsub.f32 %v4014_v0, %v518_v9  ;;  %v583_v44 = vsub.f32 %v4015_v2, %v519_v28  ;;  %v584_v3 = vsub.f32 %v4016_v60, %v520_v27  ;;  %v634_v52 = vpack.c.bf16 %v570_v58, %v570_v58 }
 0x108   :  { %v635_v26 = vpack.c.bf16 %v571_v34, %v571_v34  ;;  %v636_v7 = vpack.c.bf16 %v572_v56, %v572_v56  ;;  %v637_v31 = vpack.c.bf16 %v573_v39, %v573_v39  ;;  %v633_v4 = vpack.c.bf16 %v569_v33, %v569_v33 }
 0x109   :  { %v638_v42 = vpack.c.bf16 %v574_v50, %v574_v50  ;;  %v639_v38 = vpack.c.bf16 %v575_v12, %v575_v12  ;;  %v640_v5 = vpack.c.bf16 %v576_v10, %v576_v10  ;;  %v642_v29 = vpack.c.bf16 %v578_v48, %v578_v48 }
 0x10a   :  { %v643_v53 = vpack.c.bf16 %v579_v59, %v579_v59  ;;  %v644_v17 = vpack.c.bf16 %v580_v45, %v580_v45  ;;  %v645_v51 = vpack.c.bf16 %v581_v14, %v581_v14  ;;  %v641_v19 = vpack.c.bf16 %v577_v24, %v577_v24 }
 0x10b   :  { %v646_v46 = vpack.c.bf16 %v582_v25, %v582_v25  ;;  %v647_v57 = vpack.c.bf16 %v583_v44, %v583_v44  ;;  %v648_v23 = vpack.c.bf16 %v584_v3, %v584_v3  ;;  %v1425_v35 = vunpack.c.l.b16 %v634_v52 }
 0x10c   :  { %v1426_v36 = vunpack.c.l.b16 %v635_v26  ;;  %v1427_v13 = vunpack.c.l.b16 %v636_v7  ;;  %v1428_v49 = vunpack.c.l.b16 %v637_v31  ;;  %v1424_v63 = vunpack.c.l.b16 %v633_v4 }
 0x10d   :  { %v1429_v40 = vunpack.c.l.b16 %v638_v42  ;;  %v1430_v30 = vunpack.c.l.b16 %v639_v38  ;;  %v1431_v61 = vunpack.c.l.b16 %v640_v5  ;;  %v1433_v54 = vunpack.c.l.b16 %v642_v29 }
 0x10e   :  { %v1434_v47 = vunpack.c.l.b16 %v643_v53  ;;  %v1435_v9 = vunpack.c.l.b16 %v644_v17  ;;  %v1436_v15 = vunpack.c.l.b16 %v645_v51  ;;  %v1432_v11 = vunpack.c.l.b16 %v641_v19 }
 0x10f   :  { %v1437_v28 = vunpack.c.l.b16 %v646_v46  ;;  %v1438_v32 = vunpack.c.l.b16 %v647_v57  ;;  %v1524_v27 = vrot.slane %v1425_v35, 7  ;;  %v1439_v20 = vunpack.c.l.b16 %v648_v23 }
 0x110   :  { %v1526_v33 = vrot.slane %v1426_v36, 6  ;;  %v1528_v37 = vrot.slane %v1427_v13, 5  ;;  %v1530_v58 = vrot.slane %v1428_v49, 4  ;;  %v1532_v34 = vrot.slane %v1429_v40, 3 }
 0x111   :  { %v1525_v62 = vsel %vm791_vm6, %v1524_v27, %v1424_v63  ;;  %v1534_v41 = vrot.slane %v1430_v30, 2  ;;  %v1538_v56 = vrot.slane %v1433_v54, 7  ;;  %v1540_v39 = vrot.slane %v1434_v47, 6 }
 0x112   :  { %v1527_v1 = vsel %vm794_vm7, %v1526_v33, %v1525_v62  ;;  %v1542_v55 = vrot.slane %v1435_v9, 5  ;;  %v1544_v50 = vrot.slane %v1436_v15, 4  ;;  %v1536_v12 = vrot.slane %v1431_v61, 1 }
 0x113   :  { %v1529_v8 = vsel %vm797_vm8, %v1528_v37, %v1527_v1  ;;  %v1539_v16 = vsel %vm791_vm6, %v1538_v56, %v1432_v11  ;;  %v1546_v10 = vrot.slane %v1437_v28, 3  ;;  %v1548_v43 = vrot.slane %v1438_v32, 2 }
 0x114   :  { %v1531_v6 = vsel %vm800_vm9, %v1530_v58, %v1529_v8  ;;  %v1541_v48 = vsel %vm794_vm7, %v1540_v39, %v1539_v16  ;;  %v1550_v45 = vrot.slane %v1439_v20, 1 }
 0x115   :  { %v1533_v59 = vsel %vm803_vm10, %v1532_v34, %v1531_v6  ;;  %v1543_v22 = vsel %vm797_vm8, %v1542_v55, %v1541_v48 }
 0x116   :  { %v1535_v21 = vsel %vm806_vm11, %v1534_v41, %v1533_v59  ;;  %v1545_v14 = vsel %vm800_vm9, %v1544_v50, %v1543_v22 }
 0x117   :  { %v1537_v18 = vsel %vm809_vm12, %v1536_v12, %v1535_v21  ;;  %v1547_v24 = vsel %vm803_vm10, %v1546_v10, %v1545_v14 }
 0x118   :  { %v1549_v0 = vsel %vm806_vm11, %v1548_v43, %v1547_v24 }
 0x119   :  { %v1551_v25 = vsel %vm809_vm12, %v1550_v45, %v1549_v0 }
 0x11a   :  { %v1555_v2 = vpack.c.b16 %v1551_v25, %v1537_v18 }
 0x11c   :  { %1970 = vmatmul.mubr.msk.bf16.gmra.mrb[4].mxu0 %vm913_vm13, %v1555_v2  ;;  %2000 = vmatmul.mubr.msk.bf16.gmra.mrb[4].mxu1 %vm913_vm13, %v1555_v2 }
 0x1bf   :  { %v1967_v44 = vpop.f32.mrb[0].mxu0  ;;  %v1997_v60 = vpop.f32.mrb[0].mxu1 }
 0x1c0   :  { %v1854_v3 = vmax.f32 %v1967_v44, %v1997_v60  ;;  %v1602_v52 = vpop.f32.mrb[1].mxu0  ;;  %v1813_v26 = vpop.f32.mrb[1].mxu1 }
 0x1c1   :  { %v1852_v7 = vmax.f32 %v1602_v52, %v1813_v26  ;;  %v1968_v31 = vpop.f32.mrb[2].mxu0  ;;  %v1998_v4 = vpop.f32.mrb[2].mxu1 }
 0x1c2   :  { %1863 = vst.msk [vmem:[%s3618_s1 + $0x10] sm:$0xff] %vm1860_vm14, %v1854_v3  ;;  %v1855_v42 = vmax.f32 %v1968_v31, %v1998_v4  ;;  %v1605_v38 = vpop.f32.mrb[3].mxu0  ;;  %v1816_v5 = vpop.f32.mrb[3].mxu1 }
 0x1c3   :  { %1861 = vst.msk [vmem:[%s3618_s1] sm:$0xff] %vm1860_vm14, %v1852_v7  ;;  %v1853_v29 = vmax.f32 %v1605_v38, %v1816_v5 }
 0x1c4   :  { %1864 = vst.msk [vmem:[%s3618_s1 + $0x18] sm:$0xff] %vm1860_vm14, %v1855_v42 }
 0x1c5   :  { %1862 = vst.msk [vmem:[%s3618_s1 + $0x8] sm:$0xff] %vm1860_vm14, %v1853_v29 }
 0x1ef   :  { %v1971_v53 = vpop.f32.mrb[4].mxu0  ;;  %v2001_v17 = vpop.f32.mrb[4].mxu1 }
 0x1f0   :  { %v1858_v51 = vmax.f32 %v1971_v53, %v2001_v17  ;;  %v1618_v19 = vpop.f32.mrb[5].mxu0  ;;  %v1829_v46 = vpop.f32.mrb[5].mxu1 }
 0x1f1   :  { %v1856_v57 = vmax.f32 %v1618_v19, %v1829_v46  ;;  %v1972_v23 = vpop.f32.mrb[6].mxu0  ;;  %v2002_v35 = vpop.f32.mrb[6].mxu1 }
 0x1f2   :  { %1867 = vst.msk [vmem:[%s3618_s1 + $0x30] sm:$0xff] %vm1860_vm14, %v1858_v51  ;;  %v1859_v36 = vmax.f32 %v1972_v23, %v2002_v35  ;;  %v1621_v13 = vpop.f32.mrb[7].mxu0  ;;  %v1832_v49 = vpop.f32.mrb[7].mxu1 }
 0x1f3   :  { %1865 = vst.msk [vmem:[%s3618_s1 + $0x20] sm:$0xff] %vm1860_vm14, %v1856_v57  ;;  %v1857_v63 = vmax.f32 %v1621_v13, %v1832_v49 }
 0x1f4   :  { %1868 = vst.msk [vmem:[%s3618_s1 + $0x38] sm:$0xff] %vm1860_vm14, %v1859_v36 }
 0x1f5   :  { %1866 = vst.msk [vmem:[%s3618_s1 + $0x28] sm:$0xff] %vm1860_vm14, %v1857_v63 }

</bundles_post_ra>
